<compile_context>
chip_gen: v7x
topology: tpu7x:2x2x1
jax: 0.10.0
libtpu: 0.0.40
codegen_flags: <defaults>
</compile_context>

<pallas_src>
import functools

import jax
import jax.numpy as jnp
from jax.experimental import pallas as pl
from jax.experimental.pallas import tpu as pltpu

INPUT_SIZE = 4
HIDDEN = 32
NUM_LAYERS = 2


def _decoder_kernel(x_ref, h0_ref, c0_ref,
                    wih0_ref, whh0_ref, b0_ref,
                    wih1_ref, whh1_ref, b1_ref,
                    wlin_ref, blin_ref,
                    out_ref, h_scr, c_scr, *, chunk, hidden):
    """One grid step == CHUNK LSTM time steps. The recurrent (h, c) state is
    carried across grid iterations in VMEM scratch (grid axis 'arbitrary')."""
    H = hidden
    B = x_ref.shape[0]
    I = x_ref.shape[2]
    n = pl.program_id(0)

    @pl.when(n == 0)
    def _():
        h_scr[...] = h0_ref[...]
        c_scr[...] = c0_ref[...]

    # Recurrent / layer-1 weights loaded once per chunk.
    whh0 = whh0_ref[...]                     # (H, 4H)
    wih1 = wih1_ref[...]                     # (H, 4H)
    whh1 = whh1_ref[...]                     # (H, 4H)

    # Hoisted layer-0 input projection for the whole chunk (bias folded in).
    # One MXU op outside the serial recurrence; pipelines freely.
    x_flat = x_ref[...].reshape(B * chunk, I)
    xw0 = (jnp.dot(x_flat, wih0_ref[...], preferred_element_type=jnp.float32)
           + b0_ref[...]).reshape(B, chunk, 4 * H)

    # Bias broadcast hoisted out of the unrolled time loop.
    b1_b = jnp.broadcast_to(b1_ref[...], (B, 4 * H))

    h0 = h_scr[0]
    c0 = c_scr[0]
    h1 = h_scr[1]
    c1 = c_scr[1]

    def activate(z, c_prev):
        # g-gate columns of z were pre-scaled by 2 in the wrapper, so a single
        # sigmoid over the full (B, 4H) gate tensor covers i/f/o and gives
        # g via tanh(x) = 2*sigmoid(2x) - 1.  Same trick for tanh(c_new).
        sig = jax.nn.sigmoid(z)
        i_g = sig[:, 0 * H:1 * H]
        f_g = sig[:, 1 * H:2 * H]
        g_g = 2.0 * sig[:, 2 * H:3 * H] - 1.0
        o_g = sig[:, 3 * H:4 * H]
        c_new = f_g * c_prev + i_g * g_g
        h_new = o_g * (2.0 * jax.nn.sigmoid(2.0 * c_new) - 1.0)
        return h_new, c_new

    h1_steps = []
    # Bounded static unroll over the chunk of timesteps (chunk <= 64 by default).
    for s in range(chunk):
        # Layer 0: only the recurrent matmul sits on the serial chain.
        z0 = xw0[:, s, :] + jnp.dot(h0, whh0, preferred_element_type=jnp.float32)
        h0, c0 = activate(z0, c0)
        # Layer 1: two small dots instead of a per-step lane concat.
        z1 = (jnp.dot(h0, wih1, preferred_element_type=jnp.float32)
              + jnp.dot(h1, whh1, preferred_element_type=jnp.float32) + b1_b)
        h1, c1 = activate(z1, c1)
        h1_steps.append(h1)

    # Persist recurrent state for the next chunk.
    h_scr[0] = h0
    c_scr[0] = c0
    h_scr[1] = h1
    c_scr[1] = c1

    # Batched final projection for the whole chunk: one matmul, one block store.
    h1_all = jnp.stack(h1_steps, axis=1).reshape(B * chunk, H)
    y = (jnp.dot(h1_all, wlin_ref[...], preferred_element_type=jnp.float32)
         + blin_ref[...])                                   # (B*CHUNK, I)
    out_ref[...] = y.reshape(B, chunk, I)


def lstm_decoder_forward(x, enc_h, enc_c, params, *, chunk=None):
    """x: (B, T, I) float32 (batch_first, like nn.LSTM); enc_h/enc_c:
    (NUM_LAYERS, B, H). Returns (B, T, I), matching lstm_decoder.forward."""
    B, T, I = x.shape
    H = HIDDEN

    if chunk is None:
        if T <= 64:
            chunk = T                               # whole sequence, one grid step
        else:
            divs = [c for c in range(8, 65, 8) if T % c == 0]
            chunk = divs[-1] if divs else T         # bound the static unroll
    assert T % chunk == 0, "chunk must divide T"
    assert chunk == T or chunk % 8 == 0, "chunk must be T or a multiple of 8"
    num_chunks = T // chunk

    wih0, whh0, b0, wih1, whh1, b1, wlin, blin = params

    def scale_g(a):
        # Pre-scale the g-gate columns by 2 so a single sigmoid covers all gates
        # (tanh(x) = 2*sigmoid(2x) - 1).  Pure wrapper-side prep; raw params unchanged.
        return a.at[..., 2 * H:3 * H].multiply(2.0)

    wih0 = scale_g(wih0); whh0 = scale_g(whh0); b0 = scale_g(b0)
    wih1 = scale_g(wih1); whh1 = scale_g(whh1); b1 = scale_g(b1)

    kernel = functools.partial(_decoder_kernel, chunk=chunk, hidden=H)

    def full(rank):
        return lambda n, _r=rank: (0,) * _r

    grid_spec = pltpu.PrefetchScalarGridSpec(
        num_scalar_prefetch=0,
        grid=(num_chunks,),
        in_specs=[
            pl.BlockSpec((B, chunk, I), lambda n: (0, n, 0)),   # x (batch_first)
            pl.BlockSpec((NUM_LAYERS, B, H), full(3)),          # h0
            pl.BlockSpec((NUM_LAYERS, B, H), full(3)),          # c0
            pl.BlockSpec((I, 4 * H), full(2)),                  # W_ih layer 0 (g-scaled)
            pl.BlockSpec((H, 4 * H), full(2)),                  # W_hh layer 0
            pl.BlockSpec((1, 4 * H), full(2)),                  # b_ih0 + b_hh0
            pl.BlockSpec((H, 4 * H), full(2)),                  # W_ih layer 1
            pl.BlockSpec((H, 4 * H), full(2)),                  # W_hh layer 1
            pl.BlockSpec((1, 4 * H), full(2)),                  # b_ih1 + b_hh1
            pl.BlockSpec((H, I), full(2)),                      # linear weight^T
            pl.BlockSpec((1, I), full(2)),                      # linear bias
        ],
        out_specs=pl.BlockSpec((B, chunk, I), lambda n: (0, n, 0)),
        scratch_shapes=[
            pltpu.VMEM((NUM_LAYERS, B, H), jnp.float32),        # h state carry
            pltpu.VMEM((NUM_LAYERS, B, H), jnp.float32),        # c state carry
        ],
    )

    return pl.pallas_call(
        kernel,
        out_shape=jax.ShapeDtypeStruct((B, T, I), jnp.float32),
        grid_spec=grid_spec,
        compiler_params=pltpu.CompilerParams(
            dimension_semantics=("arbitrary",)),    # sequential recurrence
    )(x, enc_h, enc_c, wih0, whh0, b0, wih1, whh1, b1, wlin, blin)


def init_params(key):
    """Deterministic parameter init mimicking PyTorch's uniform(-1/sqrt(H), 1/sqrt(H))."""
    H, I = HIDDEN, INPUT_SIZE
    k = 1.0 / jnp.sqrt(jnp.float32(H))
    ks = jax.random.split(key, 12)
    u = lambda kk, shape: jax.random.uniform(kk, shape, jnp.float32, -k, k)

    # nn.LSTM stores (4H, in); pre-transpose to (in, 4H) for x @ W.
    wih0 = u(ks[0], (4 * H, I)).T
    whh0 = u(ks[1], (4 * H, H)).T
    b0 = (u(ks[2], (4 * H,)) + u(ks[3], (4 * H,))).reshape(1, 4 * H)
    wih1 = u(ks[4], (4 * H, H)).T
    whh1 = u(ks[5], (4 * H, H)).T
    b1 = (u(ks[6], (4 * H,)) + u(ks[7], (4 * H,))).reshape(1, 4 * H)
    # nn.Linear(H, I): weight (I, H) -> transpose to (H, I)
    wlin = u(ks[8], (I, H)).T
    blin = u(ks[9], (I,)).reshape(1, I)
    return (wih0, whh0, b0, wih1, whh1, b1, wlin, blin)


def reference_forward(x, enc_h, enc_c, params):
    """Pure-JAX reference of the stacked-LSTM + Linear forward (raw params)."""
    wih0, whh0, b0, wih1, whh1, b1, wlin, blin = params
    B, T, I = x.shape
    H = HIDDEN
    h = [enc_h[l] for l in range(NUM_LAYERS)]
    c = [enc_c[l] for l in range(NUM_LAYERS)]
    layer_params = [(wih0, whh0, b0), (wih1, whh1, b1)]
    outs = []
    for t in range(T):
        inp = x[:, t, :]
        for l, (wih, whh, b) in enumerate(layer_params):
            gates = inp @ wih + h[l] @ whh + b
            i_g = jax.nn.sigmoid(gates[:, 0 * H:1 * H])
            f_g = jax.nn.sigmoid(gates[:, 1 * H:2 * H])
            g_g = jnp.tanh(gates[:, 2 * H:3 * H])
            o_g = jax.nn.sigmoid(gates[:, 3 * H:4 * H])
            c[l] = f_g * c[l] + i_g * g_g
            h[l] = o_g * jnp.tanh(c[l])
            inp = h[l]
        outs.append(inp @ wlin + blin)
    return jnp.stack(outs, axis=1)


if __name__ == "__main__":
    key = jax.random.PRNGKey(0)
    k_param, k_x, k_h, k_c = jax.random.split(key, 4)

    B, T = 2, 8
    params = init_params(k_param)

    x = jax.random.normal(k_x, (B, T, INPUT_SIZE), jnp.float32)
    enc_h = jax.random.normal(k_h, (NUM_LAYERS, B, HIDDEN), jnp.float32)
    enc_c = jax.random.normal(k_c, (NUM_LAYERS, B, HIDDEN), jnp.float32)

    out = lstm_decoder_forward(x, enc_h, enc_c, params)
    out = jax.block_until_ready(out)

    ref = reference_forward(x, enc_h, enc_c, params)
    assert out.shape == (B, T, INPUT_SIZE), out.shape
    assert jnp.allclose(out, ref, atol=1e-4, rtol=1e-4), "mismatch vs reference"

    print("KERNEL_OK")
</pallas_src>

<mosaic_0001>
module attributes {stable_mosaic.version = 11 : i64} {
  func.func @_decoder_kernel(%arg0: i32, %arg1: memref<2x8x4xf32, #tpu.memory_space<vmem>>, %arg2: memref<2x2x32xf32, #tpu.memory_space<vmem>>, %arg3: memref<2x2x32xf32, #tpu.memory_space<vmem>>, %arg4: memref<4x128xf32, #tpu.memory_space<vmem>>, %arg5: memref<32x128xf32, #tpu.memory_space<vmem>>, %arg6: memref<1x128xf32, #tpu.memory_space<vmem>>, %arg7: memref<32x128xf32, #tpu.memory_space<vmem>>, %arg8: memref<32x128xf32, #tpu.memory_space<vmem>>, %arg9: memref<1x128xf32, #tpu.memory_space<vmem>>, %arg10: memref<32x4xf32, #tpu.memory_space<vmem>>, %arg11: memref<1x4xf32, #tpu.memory_space<vmem>>, %arg12: memref<2x8x4xf32, #tpu.memory_space<vmem>>, %arg13: memref<2x2x32xf32, #tpu.memory_space<vmem>>, %arg14: memref<2x2x32xf32, #tpu.memory_space<vmem>>) attributes {dimension_semantics = [#tpu.dimension_semantics<arbitrary>], iteration_bounds = array<i64: 1>, scalar_prefetch = 0 : i64, scratch_operands = 2 : i64, tpu.core_type = #tpu.core_type<tc>, window_params = [{transform_indices = @transform_0, window_bounds = array<i64: 2, 8, 4>}, {pipeline_mode = #tpu.pipeline_mode<synchronous>, transform_indices = @transform_1, window_bounds = array<i64: 2, 2, 32>}, {pipeline_mode = #tpu.pipeline_mode<synchronous>, transform_indices = @transform_2, window_bounds = array<i64: 2, 2, 32>}, {pipeline_mode = #tpu.pipeline_mode<synchronous>, transform_indices = @transform_3, window_bounds = array<i64: 4, 128>}, {pipeline_mode = #tpu.pipeline_mode<synchronous>, transform_indices = @transform_4, window_bounds = array<i64: 32, 128>}, {pipeline_mode = #tpu.pipeline_mode<synchronous>, transform_indices = @transform_5, window_bounds = array<i64: 1, 128>}, {pipeline_mode = #tpu.pipeline_mode<synchronous>, transform_indices = @transform_6, window_bounds = array<i64: 32, 128>}, {pipeline_mode = #tpu.pipeline_mode<synchronous>, transform_indices = @transform_7, window_bounds = array<i64: 32, 128>}, {pipeline_mode = #tpu.pipeline_mode<synchronous>, transform_indices = @transform_8, window_bounds = array<i64: 1, 128>}, {pipeline_mode = #tpu.pipeline_mode<synchronous>, transform_indices = @transform_9, window_bounds = array<i64: 32, 4>}, {pipeline_mode = #tpu.pipeline_mode<synchronous>, transform_indices = @transform_10, window_bounds = array<i64: 1, 4>}, {transform_indices = @transform_11, window_bounds = array<i64: 2, 8, 4>}]} {
    %c0_i32 = arith.constant 0 : i32
    %0 = arith.cmpi eq, %arg0, %c0_i32 : i32
    %1 = arith.extui %0 : i1 to i32
    %c0_i32_0 = arith.constant 0 : i32
    %2 = arith.cmpi ne, %1, %c0_i32_0 : i32
    scf.if %2 {
      %c0_182 = arith.constant 0 : index
      %c0_183 = arith.constant 0 : index
      %c0_184 = arith.constant 0 : index
      %566 = vector.load %arg2[%c0_182, %c0_183, %c0_184] : memref<2x2x32xf32, #tpu.memory_space<vmem>>, vector<2x2x32xf32>
      %c0_185 = arith.constant 0 : index
      %c0_186 = arith.constant 0 : index
      %c0_187 = arith.constant 0 : index
      %567 = vector.load %arg13[%c0_185, %c0_186, %c0_187] : memref<2x2x32xf32, #tpu.memory_space<vmem>>, vector<2x2x32xf32>
      tpu.vector_store %arg13[%c0_185, %c0_186, %c0_187], %566 {strides = array<i32>} : memref<2x2x32xf32, #tpu.memory_space<vmem>>, vector<2x2x32xf32>,
      %c0_188 = arith.constant 0 : index
      %c0_189 = arith.constant 0 : index
      %c0_190 = arith.constant 0 : index
      %568 = vector.load %arg3[%c0_188, %c0_189, %c0_190] : memref<2x2x32xf32, #tpu.memory_space<vmem>>, vector<2x2x32xf32>
      %c0_191 = arith.constant 0 : index
      %c0_192 = arith.constant 0 : index
      %c0_193 = arith.constant 0 : index
      %569 = vector.load %arg14[%c0_191, %c0_192, %c0_193] : memref<2x2x32xf32, #tpu.memory_space<vmem>>, vector<2x2x32xf32>
      tpu.vector_store %arg14[%c0_191, %c0_192, %c0_193], %568 {strides = array<i32>} : memref<2x2x32xf32, #tpu.memory_space<vmem>>, vector<2x2x32xf32>,
    } else {
    }
    %c0 = arith.constant 0 : index
    %c0_1 = arith.constant 0 : index
    %3 = vector.load %arg5[%c0, %c0_1] : memref<32x128xf32, #tpu.memory_space<vmem>>, vector<32x128xf32>
    %c0_2 = arith.constant 0 : index
    %c0_3 = arith.constant 0 : index
    %4 = vector.load %arg7[%c0_2, %c0_3] : memref<32x128xf32, #tpu.memory_space<vmem>>, vector<32x128xf32>
    %c0_4 = arith.constant 0 : index
    %c0_5 = arith.constant 0 : index
    %5 = vector.load %arg8[%c0_4, %c0_5] : memref<32x128xf32, #tpu.memory_space<vmem>>, vector<32x128xf32>
    %c0_6 = arith.constant 0 : index
    %c0_7 = arith.constant 0 : index
    %c0_8 = arith.constant 0 : index
    %6 = vector.load %arg1[%c0_6, %c0_7, %c0_8] : memref<2x8x4xf32, #tpu.memory_space<vmem>>, vector<2x8x4xf32>
    %7 = vector.shape_cast %6 : vector<2x8x4xf32> to vector<16x4xf32>
    %c0_9 = arith.constant 0 : index
    %c0_10 = arith.constant 0 : index
    %8 = vector.load %arg4[%c0_9, %c0_10] : memref<4x128xf32, #tpu.memory_space<vmem>>, vector<4x128xf32>
    %cst = arith.constant dense<0.000000e+00> : vector<16x128xf32>
    %9 = tpu.matmul %7, %8, %cst {dimension_numbers = #tpu.dot_dimension_numbers<[1], [0], [0], [1], [0, 0, 1, 1], [], []>} : vector<16x4xf32>, vector<4x128xf32>, vector<16x128xf32> -> vector<16x128xf32>
    %c0_11 = arith.constant 0 : index
    %c0_12 = arith.constant 0 : index
    %10 = vector.load %arg6[%c0_11, %c0_12] : memref<1x128xf32, #tpu.memory_space<vmem>>, vector<1x128xf32>
    %11 = vector.broadcast %10 : vector<1x128xf32> to vector<16x128xf32>
    %12 = arith.addf %9, %11 : vector<16x128xf32>
    %13 = vector.shape_cast %12 : vector<16x128xf32> to vector<2x8x128xf32>
    %c0_13 = arith.constant 0 : index
    %c0_14 = arith.constant 0 : index
    %14 = vector.load %arg9[%c0_13, %c0_14] : memref<1x128xf32, #tpu.memory_space<vmem>>, vector<1x128xf32>
    %15 = vector.shape_cast %14 : vector<1x128xf32> to vector<1x128xf32>
    %16 = vector.broadcast %15 : vector<1x128xf32> to vector<2x128xf32>
    %c0_15 = arith.constant 0 : index
    %c0_16 = arith.constant 0 : index
    %c0_17 = arith.constant 0 : index
    %17 = vector.load %arg13[%c0_15, %c0_16, %c0_17] : memref<2x2x32xf32, #tpu.memory_space<vmem>>, vector<1x2x32xf32>
    %18 = vector.shape_cast %17 : vector<1x2x32xf32> to vector<2x32xf32>
    %c0_18 = arith.constant 0 : index
    %c0_19 = arith.constant 0 : index
    %c0_20 = arith.constant 0 : index
    %19 = vector.load %arg14[%c0_18, %c0_19, %c0_20] : memref<2x2x32xf32, #tpu.memory_space<vmem>>, vector<1x2x32xf32>
    %20 = vector.shape_cast %19 : vector<1x2x32xf32> to vector<2x32xf32>
    %c1 = arith.constant 1 : index
    %c0_21 = arith.constant 0 : index
    %c0_22 = arith.constant 0 : index
    %21 = vector.load %arg13[%c1, %c0_21, %c0_22] : memref<2x2x32xf32, #tpu.memory_space<vmem>>, vector<1x2x32xf32>
    %22 = vector.shape_cast %21 : vector<1x2x32xf32> to vector<2x32xf32>
    %c1_23 = arith.constant 1 : index
    %c0_24 = arith.constant 0 : index
    %c0_25 = arith.constant 0 : index
    %23 = vector.load %arg14[%c1_23, %c0_24, %c0_25] : memref<2x2x32xf32, #tpu.memory_space<vmem>>, vector<1x2x32xf32>
    %24 = vector.shape_cast %23 : vector<1x2x32xf32> to vector<2x32xf32>
    %25 = vector.extract_strided_slice %13 {offsets = [0, 0, 0], sizes = [2, 1, 128], strides = [1, 1, 1]} : vector<2x8x128xf32> to vector<2x1x128xf32>
    %26 = vector.shape_cast %25 : vector<2x1x128xf32> to vector<2x128xf32>
    %cst_26 = arith.constant dense<0.000000e+00> : vector<2x128xf32>
    %27 = tpu.matmul %18, %3, %cst_26 {dimension_numbers = #tpu.dot_dimension_numbers<[1], [0], [0], [1], [0, 0, 1, 1], [], []>} : vector<2x32xf32>, vector<32x128xf32>, vector<2x128xf32> -> vector<2x128xf32>
    %28 = arith.addf %26, %27 : vector<2x128xf32>
    %29 = arith.negf %28 : vector<2x128xf32>
    %30 = math.exp %29 : vector<2x128xf32>
    %cst_27 = arith.constant 1.000000e+00 : f32
    %31 = vector.broadcast %cst_27 : f32 to vector<2x128xf32>
    %32 = arith.addf %31, %30 : vector<2x128xf32>
    %33 = arith.divf %31, %32 : vector<2x128xf32>
    %34 = vector.extract_strided_slice %33 {offsets = [0, 0], sizes = [2, 32], strides = [1, 1]} : vector<2x128xf32> to vector<2x32xf32>
    %35 = vector.extract_strided_slice %33 {offsets = [0, 32], sizes = [2, 32], strides = [1, 1]} : vector<2x128xf32> to vector<2x32xf32>
    %36 = vector.extract_strided_slice %33 {offsets = [0, 64], sizes = [2, 32], strides = [1, 1]} : vector<2x128xf32> to vector<2x32xf32>
    %cst_28 = arith.constant 2.000000e+00 : f32
    %37 = vector.broadcast %cst_28 : f32 to vector<2x32xf32>
    %38 = arith.mulf %37, %36 : vector<2x32xf32>
    %cst_29 = arith.constant 1.000000e+00 : f32
    %39 = vector.broadcast %cst_29 : f32 to vector<2x32xf32>
    %40 = arith.subf %38, %39 : vector<2x32xf32>
    %41 = vector.extract_strided_slice %33 {offsets = [0, 96], sizes = [2, 32], strides = [1, 1]} : vector<2x128xf32> to vector<2x32xf32>
    %42 = arith.mulf %35, %20 : vector<2x32xf32>
    %43 = arith.mulf %34, %40 : vector<2x32xf32>
    %44 = arith.addf %42, %43 : vector<2x32xf32>
    %cst_30 = arith.constant 2.000000e+00 : f32
    %45 = vector.broadcast %cst_30 : f32 to vector<2x32xf32>
    %46 = arith.mulf %45, %44 : vector<2x32xf32>
    %47 = arith.negf %46 : vector<2x32xf32>
    %48 = math.exp %47 : vector<2x32xf32>
    %cst_31 = arith.constant 1.000000e+00 : f32
    %49 = vector.broadcast %cst_31 : f32 to vector<2x32xf32>
    %50 = arith.addf %49, %48 : vector<2x32xf32>
    %51 = arith.divf %49, %50 : vector<2x32xf32>
    %cst_32 = arith.constant 2.000000e+00 : f32
    %52 = vector.broadcast %cst_32 : f32 to vector<2x32xf32>
    %53 = arith.mulf %52, %51 : vector<2x32xf32>
    %cst_33 = arith.constant 1.000000e+00 : f32
    %54 = vector.broadcast %cst_33 : f32 to vector<2x32xf32>
    %55 = arith.subf %53, %54 : vector<2x32xf32>
    %56 = arith.mulf %41, %55 : vector<2x32xf32>
    %cst_34 = arith.constant dense<0.000000e+00> : vector<2x128xf32>
    %57 = tpu.matmul %56, %4, %cst_34 {dimension_numbers = #tpu.dot_dimension_numbers<[1], [0], [0], [1], [0, 0, 1, 1], [], []>} : vector<2x32xf32>, vector<32x128xf32>, vector<2x128xf32> -> vector<2x128xf32>
    %cst_35 = arith.constant dense<0.000000e+00> : vector<2x128xf32>
    %58 = tpu.matmul %22, %5, %cst_35 {dimension_numbers = #tpu.dot_dimension_numbers<[1], [0], [0], [1], [0, 0, 1, 1], [], []>} : vector<2x32xf32>, vector<32x128xf32>, vector<2x128xf32> -> vector<2x128xf32>
    %59 = arith.addf %57, %58 : vector<2x128xf32>
    %60 = arith.addf %59, %16 : vector<2x128xf32>
    %61 = arith.negf %60 : vector<2x128xf32>
    %62 = math.exp %61 : vector<2x128xf32>
    %cst_36 = arith.constant 1.000000e+00 : f32
    %63 = vector.broadcast %cst_36 : f32 to vector<2x128xf32>
    %64 = arith.addf %63, %62 : vector<2x128xf32>
    %65 = arith.divf %63, %64 : vector<2x128xf32>
    %66 = vector.extract_strided_slice %65 {offsets = [0, 0], sizes = [2, 32], strides = [1, 1]} : vector<2x128xf32> to vector<2x32xf32>
    %67 = vector.extract_strided_slice %65 {offsets = [0, 32], sizes = [2, 32], strides = [1, 1]} : vector<2x128xf32> to vector<2x32xf32>
    %68 = vector.extract_strided_slice %65 {offsets = [0, 64], sizes = [2, 32], strides = [1, 1]} : vector<2x128xf32> to vector<2x32xf32>
    %cst_37 = arith.constant 2.000000e+00 : f32
    %69 = vector.broadcast %cst_37 : f32 to vector<2x32xf32>
    %70 = arith.mulf %69, %68 : vector<2x32xf32>
    %cst_38 = arith.constant 1.000000e+00 : f32
    %71 = vector.broadcast %cst_38 : f32 to vector<2x32xf32>
    %72 = arith.subf %70, %71 : vector<2x32xf32>
    %73 = vector.extract_strided_slice %65 {offsets = [0, 96], sizes = [2, 32], strides = [1, 1]} : vector<2x128xf32> to vector<2x32xf32>
    %74 = arith.mulf %67, %24 : vector<2x32xf32>
    %75 = arith.mulf %66, %72 : vector<2x32xf32>
    %76 = arith.addf %74, %75 : vector<2x32xf32>
    %cst_39 = arith.constant 2.000000e+00 : f32
    %77 = vector.broadcast %cst_39 : f32 to vector<2x32xf32>
    %78 = arith.mulf %77, %76 : vector<2x32xf32>
    %79 = arith.negf %78 : vector<2x32xf32>
    %80 = math.exp %79 : vector<2x32xf32>
    %cst_40 = arith.constant 1.000000e+00 : f32
    %81 = vector.broadcast %cst_40 : f32 to vector<2x32xf32>
    %82 = arith.addf %81, %80 : vector<2x32xf32>
    %83 = arith.divf %81, %82 : vector<2x32xf32>
    %cst_41 = arith.constant 2.000000e+00 : f32
    %84 = vector.broadcast %cst_41 : f32 to vector<2x32xf32>
    %85 = arith.mulf %84, %83 : vector<2x32xf32>
    %cst_42 = arith.constant 1.000000e+00 : f32
    %86 = vector.broadcast %cst_42 : f32 to vector<2x32xf32>
    %87 = arith.subf %85, %86 : vector<2x32xf32>
    %88 = arith.mulf %73, %87 : vector<2x32xf32>
    %89 = vector.extract_strided_slice %13 {offsets = [0, 1, 0], sizes = [2, 1, 128], strides = [1, 1, 1]} : vector<2x8x128xf32> to vector<2x1x128xf32>
    %90 = vector.shape_cast %89 : vector<2x1x128xf32> to vector<2x128xf32>
    %cst_43 = arith.constant dense<0.000000e+00> : vector<2x128xf32>
    %91 = tpu.matmul %56, %3, %cst_43 {dimension_numbers = #tpu.dot_dimension_numbers<[1], [0], [0], [1], [0, 0, 1, 1], [], []>} : vector<2x32xf32>, vector<32x128xf32>, vector<2x128xf32> -> vector<2x128xf32>
    %92 = arith.addf %90, %91 : vector<2x128xf32>
    %93 = arith.negf %92 : vector<2x128xf32>
    %94 = math.exp %93 : vector<2x128xf32>
    %cst_44 = arith.constant 1.000000e+00 : f32
    %95 = vector.broadcast %cst_44 : f32 to vector<2x128xf32>
    %96 = arith.addf %95, %94 : vector<2x128xf32>
    %97 = arith.divf %95, %96 : vector<2x128xf32>
    %98 = vector.extract_strided_slice %97 {offsets = [0, 0], sizes = [2, 32], strides = [1, 1]} : vector<2x128xf32> to vector<2x32xf32>
    %99 = vector.extract_strided_slice %97 {offsets = [0, 32], sizes = [2, 32], strides = [1, 1]} : vector<2x128xf32> to vector<2x32xf32>
    %100 = vector.extract_strided_slice %97 {offsets = [0, 64], sizes = [2, 32], strides = [1, 1]} : vector<2x128xf32> to vector<2x32xf32>
    %cst_45 = arith.constant 2.000000e+00 : f32
    %101 = vector.broadcast %cst_45 : f32 to vector<2x32xf32>
    %102 = arith.mulf %101, %100 : vector<2x32xf32>
    %cst_46 = arith.constant 1.000000e+00 : f32
    %103 = vector.broadcast %cst_46 : f32 to vector<2x32xf32>
    %104 = arith.subf %102, %103 : vector<2x32xf32>
    %105 = vector.extract_strided_slice %97 {offsets = [0, 96], sizes = [2, 32], strides = [1, 1]} : vector<2x128xf32> to vector<2x32xf32>
    %106 = arith.mulf %99, %44 : vector<2x32xf32>
    %107 = arith.mulf %98, %104 : vector<2x32xf32>
    %108 = arith.addf %106, %107 : vector<2x32xf32>
    %cst_47 = arith.constant 2.000000e+00 : f32
    %109 = vector.broadcast %cst_47 : f32 to vector<2x32xf32>
    %110 = arith.mulf %109, %108 : vector<2x32xf32>
    %111 = arith.negf %110 : vector<2x32xf32>
    %112 = math.exp %111 : vector<2x32xf32>
    %cst_48 = arith.constant 1.000000e+00 : f32
    %113 = vector.broadcast %cst_48 : f32 to vector<2x32xf32>
    %114 = arith.addf %113, %112 : vector<2x32xf32>
    %115 = arith.divf %113, %114 : vector<2x32xf32>
    %cst_49 = arith.constant 2.000000e+00 : f32
    %116 = vector.broadcast %cst_49 : f32 to vector<2x32xf32>
    %117 = arith.mulf %116, %115 : vector<2x32xf32>
    %cst_50 = arith.constant 1.000000e+00 : f32
    %118 = vector.broadcast %cst_50 : f32 to vector<2x32xf32>
    %119 = arith.subf %117, %118 : vector<2x32xf32>
    %120 = arith.mulf %105, %119 : vector<2x32xf32>
    %cst_51 = arith.constant dense<0.000000e+00> : vector<2x128xf32>
    %121 = tpu.matmul %120, %4, %cst_51 {dimension_numbers = #tpu.dot_dimension_numbers<[1], [0], [0], [1], [0, 0, 1, 1], [], []>} : vector<2x32xf32>, vector<32x128xf32>, vector<2x128xf32> -> vector<2x128xf32>
    %cst_52 = arith.constant dense<0.000000e+00> : vector<2x128xf32>
    %122 = tpu.matmul %88, %5, %cst_52 {dimension_numbers = #tpu.dot_dimension_numbers<[1], [0], [0], [1], [0, 0, 1, 1], [], []>} : vector<2x32xf32>, vector<32x128xf32>, vector<2x128xf32> -> vector<2x128xf32>
    %123 = arith.addf %121, %122 : vector<2x128xf32>
    %124 = arith.addf %123, %16 : vector<2x128xf32>
    %125 = arith.negf %124 : vector<2x128xf32>
    %126 = math.exp %125 : vector<2x128xf32>
    %cst_53 = arith.constant 1.000000e+00 : f32
    %127 = vector.broadcast %cst_53 : f32 to vector<2x128xf32>
    %128 = arith.addf %127, %126 : vector<2x128xf32>
    %129 = arith.divf %127, %128 : vector<2x128xf32>
    %130 = vector.extract_strided_slice %129 {offsets = [0, 0], sizes = [2, 32], strides = [1, 1]} : vector<2x128xf32> to vector<2x32xf32>
    %131 = vector.extract_strided_slice %129 {offsets = [0, 32], sizes = [2, 32], strides = [1, 1]} : vector<2x128xf32> to vector<2x32xf32>
    %132 = vector.extract_strided_slice %129 {offsets = [0, 64], sizes = [2, 32], strides = [1, 1]} : vector<2x128xf32> to vector<2x32xf32>
    %cst_54 = arith.constant 2.000000e+00 : f32
    %133 = vector.broadcast %cst_54 : f32 to vector<2x32xf32>
    %134 = arith.mulf %133, %132 : vector<2x32xf32>
    %cst_55 = arith.constant 1.000000e+00 : f32
    %135 = vector.broadcast %cst_55 : f32 to vector<2x32xf32>
    %136 = arith.subf %134, %135 : vector<2x32xf32>
    %137 = vector.extract_strided_slice %129 {offsets = [0, 96], sizes = [2, 32], strides = [1, 1]} : vector<2x128xf32> to vector<2x32xf32>
    %138 = arith.mulf %131, %76 : vector<2x32xf32>
    %139 = arith.mulf %130, %136 : vector<2x32xf32>
    %140 = arith.addf %138, %139 : vector<2x32xf32>
    %cst_56 = arith.constant 2.000000e+00 : f32
    %141 = vector.broadcast %cst_56 : f32 to vector<2x32xf32>
    %142 = arith.mulf %141, %140 : vector<2x32xf32>
    %143 = arith.negf %142 : vector<2x32xf32>
    %144 = math.exp %143 : vector<2x32xf32>
    %cst_57 = arith.constant 1.000000e+00 : f32
    %145 = vector.broadcast %cst_57 : f32 to vector<2x32xf32>
    %146 = arith.addf %145, %144 : vector<2x32xf32>
    %147 = arith.divf %145, %146 : vector<2x32xf32>
    %cst_58 = arith.constant 2.000000e+00 : f32
    %148 = vector.broadcast %cst_58 : f32 to vector<2x32xf32>
    %149 = arith.mulf %148, %147 : vector<2x32xf32>
    %cst_59 = arith.constant 1.000000e+00 : f32
    %150 = vector.broadcast %cst_59 : f32 to vector<2x32xf32>
    %151 = arith.subf %149, %150 : vector<2x32xf32>
    %152 = arith.mulf %137, %151 : vector<2x32xf32>
    %153 = vector.extract_strided_slice %13 {offsets = [0, 2, 0], sizes = [2, 1, 128], strides = [1, 1, 1]} : vector<2x8x128xf32> to vector<2x1x128xf32>
    %154 = vector.shape_cast %153 : vector<2x1x128xf32> to vector<2x128xf32>
    %cst_60 = arith.constant dense<0.000000e+00> : vector<2x128xf32>
    %155 = tpu.matmul %120, %3, %cst_60 {dimension_numbers = #tpu.dot_dimension_numbers<[1], [0], [0], [1], [0, 0, 1, 1], [], []>} : vector<2x32xf32>, vector<32x128xf32>, vector<2x128xf32> -> vector<2x128xf32>
    %156 = arith.addf %154, %155 : vector<2x128xf32>
    %157 = arith.negf %156 : vector<2x128xf32>
    %158 = math.exp %157 : vector<2x128xf32>
    %cst_61 = arith.constant 1.000000e+00 : f32
    %159 = vector.broadcast %cst_61 : f32 to vector<2x128xf32>
    %160 = arith.addf %159, %158 : vector<2x128xf32>
    %161 = arith.divf %159, %160 : vector<2x128xf32>
    %162 = vector.extract_strided_slice %161 {offsets = [0, 0], sizes = [2, 32], strides = [1, 1]} : vector<2x128xf32> to vector<2x32xf32>
    %163 = vector.extract_strided_slice %161 {offsets = [0, 32], sizes = [2, 32], strides = [1, 1]} : vector<2x128xf32> to vector<2x32xf32>
    %164 = vector.extract_strided_slice %161 {offsets = [0, 64], sizes = [2, 32], strides = [1, 1]} : vector<2x128xf32> to vector<2x32xf32>
    %cst_62 = arith.constant 2.000000e+00 : f32
    %165 = vector.broadcast %cst_62 : f32 to vector<2x32xf32>
    %166 = arith.mulf %165, %164 : vector<2x32xf32>
    %cst_63 = arith.constant 1.000000e+00 : f32
    %167 = vector.broadcast %cst_63 : f32 to vector<2x32xf32>
    %168 = arith.subf %166, %167 : vector<2x32xf32>
    %169 = vector.extract_strided_slice %161 {offsets = [0, 96], sizes = [2, 32], strides = [1, 1]} : vector<2x128xf32> to vector<2x32xf32>
    %170 = arith.mulf %163, %108 : vector<2x32xf32>
    %171 = arith.mulf %162, %168 : vector<2x32xf32>
    %172 = arith.addf %170, %171 : vector<2x32xf32>
    %cst_64 = arith.constant 2.000000e+00 : f32
    %173 = vector.broadcast %cst_64 : f32 to vector<2x32xf32>
    %174 = arith.mulf %173, %172 : vector<2x32xf32>
    %175 = arith.negf %174 : vector<2x32xf32>
    %176 = math.exp %175 : vector<2x32xf32>
    %cst_65 = arith.constant 1.000000e+00 : f32
    %177 = vector.broadcast %cst_65 : f32 to vector<2x32xf32>
    %178 = arith.addf %177, %176 : vector<2x32xf32>
    %179 = arith.divf %177, %178 : vector<2x32xf32>
    %cst_66 = arith.constant 2.000000e+00 : f32
    %180 = vector.broadcast %cst_66 : f32 to vector<2x32xf32>
    %181 = arith.mulf %180, %179 : vector<2x32xf32>
    %cst_67 = arith.constant 1.000000e+00 : f32
    %182 = vector.broadcast %cst_67 : f32 to vector<2x32xf32>
    %183 = arith.subf %181, %182 : vector<2x32xf32>
    %184 = arith.mulf %169, %183 : vector<2x32xf32>
    %cst_68 = arith.constant dense<0.000000e+00> : vector<2x128xf32>
    %185 = tpu.matmul %184, %4, %cst_68 {dimension_numbers = #tpu.dot_dimension_numbers<[1], [0], [0], [1], [0, 0, 1, 1], [], []>} : vector<2x32xf32>, vector<32x128xf32>, vector<2x128xf32> -> vector<2x128xf32>
    %cst_69 = arith.constant dense<0.000000e+00> : vector<2x128xf32>
    %186 = tpu.matmul %152, %5, %cst_69 {dimension_numbers = #tpu.dot_dimension_numbers<[1], [0], [0], [1], [0, 0, 1, 1], [], []>} : vector<2x32xf32>, vector<32x128xf32>, vector<2x128xf32> -> vector<2x128xf32>
    %187 = arith.addf %185, %186 : vector<2x128xf32>
    %188 = arith.addf %187, %16 : vector<2x128xf32>
    %189 = arith.negf %188 : vector<2x128xf32>
    %190 = math.exp %189 : vector<2x128xf32>
    %cst_70 = arith.constant 1.000000e+00 : f32
    %191 = vector.broadcast %cst_70 : f32 to vector<2x128xf32>
    %192 = arith.addf %191, %190 : vector<2x128xf32>
    %193 = arith.divf %191, %192 : vector<2x128xf32>
    %194 = vector.extract_strided_slice %193 {offsets = [0, 0], sizes = [2, 32], strides = [1, 1]} : vector<2x128xf32> to vector<2x32xf32>
    %195 = vector.extract_strided_slice %193 {offsets = [0, 32], sizes = [2, 32], strides = [1, 1]} : vector<2x128xf32> to vector<2x32xf32>
    %196 = vector.extract_strided_slice %193 {offsets = [0, 64], sizes = [2, 32], strides = [1, 1]} : vector<2x128xf32> to vector<2x32xf32>
    %cst_71 = arith.constant 2.000000e+00 : f32
    %197 = vector.broadcast %cst_71 : f32 to vector<2x32xf32>
    %198 = arith.mulf %197, %196 : vector<2x32xf32>
    %cst_72 = arith.constant 1.000000e+00 : f32
    %199 = vector.broadcast %cst_72 : f32 to vector<2x32xf32>
    %200 = arith.subf %198, %199 : vector<2x32xf32>
    %201 = vector.extract_strided_slice %193 {offsets = [0, 96], sizes = [2, 32], strides = [1, 1]} : vector<2x128xf32> to vector<2x32xf32>
    %202 = arith.mulf %195, %140 : vector<2x32xf32>
    %203 = arith.mulf %194, %200 : vector<2x32xf32>
    %204 = arith.addf %202, %203 : vector<2x32xf32>
    %cst_73 = arith.constant 2.000000e+00 : f32
    %205 = vector.broadcast %cst_73 : f32 to vector<2x32xf32>
    %206 = arith.mulf %205, %204 : vector<2x32xf32>
    %207 = arith.negf %206 : vector<2x32xf32>
    %208 = math.exp %207 : vector<2x32xf32>
    %cst_74 = arith.constant 1.000000e+00 : f32
    %209 = vector.broadcast %cst_74 : f32 to vector<2x32xf32>
    %210 = arith.addf %209, %208 : vector<2x32xf32>
    %211 = arith.divf %209, %210 : vector<2x32xf32>
    %cst_75 = arith.constant 2.000000e+00 : f32
    %212 = vector.broadcast %cst_75 : f32 to vector<2x32xf32>
    %213 = arith.mulf %212, %211 : vector<2x32xf32>
    %cst_76 = arith.constant 1.000000e+00 : f32
    %214 = vector.broadcast %cst_76 : f32 to vector<2x32xf32>
    %215 = arith.subf %213, %214 : vector<2x32xf32>
    %216 = arith.mulf %201, %215 : vector<2x32xf32>
    %217 = vector.extract_strided_slice %13 {offsets = [0, 3, 0], sizes = [2, 1, 128], strides = [1, 1, 1]} : vector<2x8x128xf32> to vector<2x1x128xf32>
    %218 = vector.shape_cast %217 : vector<2x1x128xf32> to vector<2x128xf32>
    %cst_77 = arith.constant dense<0.000000e+00> : vector<2x128xf32>
    %219 = tpu.matmul %184, %3, %cst_77 {dimension_numbers = #tpu.dot_dimension_numbers<[1], [0], [0], [1], [0, 0, 1, 1], [], []>} : vector<2x32xf32>, vector<32x128xf32>, vector<2x128xf32> -> vector<2x128xf32>
    %220 = arith.addf %218, %219 : vector<2x128xf32>
    %221 = arith.negf %220 : vector<2x128xf32>
    %222 = math.exp %221 : vector<2x128xf32>
    %cst_78 = arith.constant 1.000000e+00 : f32
    %223 = vector.broadcast %cst_78 : f32 to vector<2x128xf32>
    %224 = arith.addf %223, %222 : vector<2x128xf32>
    %225 = arith.divf %223, %224 : vector<2x128xf32>
    %226 = vector.extract_strided_slice %225 {offsets = [0, 0], sizes = [2, 32], strides = [1, 1]} : vector<2x128xf32> to vector<2x32xf32>
    %227 = vector.extract_strided_slice %225 {offsets = [0, 32], sizes = [2, 32], strides = [1, 1]} : vector<2x128xf32> to vector<2x32xf32>
    %228 = vector.extract_strided_slice %225 {offsets = [0, 64], sizes = [2, 32], strides = [1, 1]} : vector<2x128xf32> to vector<2x32xf32>
    %cst_79 = arith.constant 2.000000e+00 : f32
    %229 = vector.broadcast %cst_79 : f32 to vector<2x32xf32>
    %230 = arith.mulf %229, %228 : vector<2x32xf32>
    %cst_80 = arith.constant 1.000000e+00 : f32
    %231 = vector.broadcast %cst_80 : f32 to vector<2x32xf32>
    %232 = arith.subf %230, %231 : vector<2x32xf32>
    %233 = vector.extract_strided_slice %225 {offsets = [0, 96], sizes = [2, 32], strides = [1, 1]} : vector<2x128xf32> to vector<2x32xf32>
    %234 = arith.mulf %227, %172 : vector<2x32xf32>
    %235 = arith.mulf %226, %232 : vector<2x32xf32>
    %236 = arith.addf %234, %235 : vector<2x32xf32>
    %cst_81 = arith.constant 2.000000e+00 : f32
    %237 = vector.broadcast %cst_81 : f32 to vector<2x32xf32>
    %238 = arith.mulf %237, %236 : vector<2x32xf32>
    %239 = arith.negf %238 : vector<2x32xf32>
    %240 = math.exp %239 : vector<2x32xf32>
    %cst_82 = arith.constant 1.000000e+00 : f32
    %241 = vector.broadcast %cst_82 : f32 to vector<2x32xf32>
    %242 = arith.addf %241, %240 : vector<2x32xf32>
    %243 = arith.divf %241, %242 : vector<2x32xf32>
    %cst_83 = arith.constant 2.000000e+00 : f32
    %244 = vector.broadcast %cst_83 : f32 to vector<2x32xf32>
    %245 = arith.mulf %244, %243 : vector<2x32xf32>
    %cst_84 = arith.constant 1.000000e+00 : f32
    %246 = vector.broadcast %cst_84 : f32 to vector<2x32xf32>
    %247 = arith.subf %245, %246 : vector<2x32xf32>
    %248 = arith.mulf %233, %247 : vector<2x32xf32>
    %cst_85 = arith.constant dense<0.000000e+00> : vector<2x128xf32>
    %249 = tpu.matmul %248, %4, %cst_85 {dimension_numbers = #tpu.dot_dimension_numbers<[1], [0], [0], [1], [0, 0, 1, 1], [], []>} : vector<2x32xf32>, vector<32x128xf32>, vector<2x128xf32> -> vector<2x128xf32>
    %cst_86 = arith.constant dense<0.000000e+00> : vector<2x128xf32>
    %250 = tpu.matmul %216, %5, %cst_86 {dimension_numbers = #tpu.dot_dimension_numbers<[1], [0], [0], [1], [0, 0, 1, 1], [], []>} : vector<2x32xf32>, vector<32x128xf32>, vector<2x128xf32> -> vector<2x128xf32>
    %251 = arith.addf %249, %250 : vector<2x128xf32>
    %252 = arith.addf %251, %16 : vector<2x128xf32>
    %253 = arith.negf %252 : vector<2x128xf32>
    %254 = math.exp %253 : vector<2x128xf32>
    %cst_87 = arith.constant 1.000000e+00 : f32
    %255 = vector.broadcast %cst_87 : f32 to vector<2x128xf32>
    %256 = arith.addf %255, %254 : vector<2x128xf32>
    %257 = arith.divf %255, %256 : vector<2x128xf32>
    %258 = vector.extract_strided_slice %257 {offsets = [0, 0], sizes = [2, 32], strides = [1, 1]} : vector<2x128xf32> to vector<2x32xf32>
    %259 = vector.extract_strided_slice %257 {offsets = [0, 32], sizes = [2, 32], strides = [1, 1]} : vector<2x128xf32> to vector<2x32xf32>
    %260 = vector.extract_strided_slice %257 {offsets = [0, 64], sizes = [2, 32], strides = [1, 1]} : vector<2x128xf32> to vector<2x32xf32>
    %cst_88 = arith.constant 2.000000e+00 : f32
    %261 = vector.broadcast %cst_88 : f32 to vector<2x32xf32>
    %262 = arith.mulf %261, %260 : vector<2x32xf32>
    %cst_89 = arith.constant 1.000000e+00 : f32
    %263 = vector.broadcast %cst_89 : f32 to vector<2x32xf32>
    %264 = arith.subf %262, %263 : vector<2x32xf32>
    %265 = vector.extract_strided_slice %257 {offsets = [0, 96], sizes = [2, 32], strides = [1, 1]} : vector<2x128xf32> to vector<2x32xf32>
    %266 = arith.mulf %259, %204 : vector<2x32xf32>
    %267 = arith.mulf %258, %264 : vector<2x32xf32>
    %268 = arith.addf %266, %267 : vector<2x32xf32>
    %cst_90 = arith.constant 2.000000e+00 : f32
    %269 = vector.broadcast %cst_90 : f32 to vector<2x32xf32>
    %270 = arith.mulf %269, %268 : vector<2x32xf32>
    %271 = arith.negf %270 : vector<2x32xf32>
    %272 = math.exp %271 : vector<2x32xf32>
    %cst_91 = arith.constant 1.000000e+00 : f32
    %273 = vector.broadcast %cst_91 : f32 to vector<2x32xf32>
    %274 = arith.addf %273, %272 : vector<2x32xf32>
    %275 = arith.divf %273, %274 : vector<2x32xf32>
    %cst_92 = arith.constant 2.000000e+00 : f32
    %276 = vector.broadcast %cst_92 : f32 to vector<2x32xf32>
    %277 = arith.mulf %276, %275 : vector<2x32xf32>
    %cst_93 = arith.constant 1.000000e+00 : f32
    %278 = vector.broadcast %cst_93 : f32 to vector<2x32xf32>
    %279 = arith.subf %277, %278 : vector<2x32xf32>
    %280 = arith.mulf %265, %279 : vector<2x32xf32>
    %281 = vector.extract_strided_slice %13 {offsets = [0, 4, 0], sizes = [2, 1, 128], strides = [1, 1, 1]} : vector<2x8x128xf32> to vector<2x1x128xf32>
    %282 = vector.shape_cast %281 : vector<2x1x128xf32> to vector<2x128xf32>
    %cst_94 = arith.constant dense<0.000000e+00> : vector<2x128xf32>
    %283 = tpu.matmul %248, %3, %cst_94 {dimension_numbers = #tpu.dot_dimension_numbers<[1], [0], [0], [1], [0, 0, 1, 1], [], []>} : vector<2x32xf32>, vector<32x128xf32>, vector<2x128xf32> -> vector<2x128xf32>
    %284 = arith.addf %282, %283 : vector<2x128xf32>
    %285 = arith.negf %284 : vector<2x128xf32>
    %286 = math.exp %285 : vector<2x128xf32>
    %cst_95 = arith.constant 1.000000e+00 : f32
    %287 = vector.broadcast %cst_95 : f32 to vector<2x128xf32>
    %288 = arith.addf %287, %286 : vector<2x128xf32>
    %289 = arith.divf %287, %288 : vector<2x128xf32>
    %290 = vector.extract_strided_slice %289 {offsets = [0, 0], sizes = [2, 32], strides = [1, 1]} : vector<2x128xf32> to vector<2x32xf32>
    %291 = vector.extract_strided_slice %289 {offsets = [0, 32], sizes = [2, 32], strides = [1, 1]} : vector<2x128xf32> to vector<2x32xf32>
    %292 = vector.extract_strided_slice %289 {offsets = [0, 64], sizes = [2, 32], strides = [1, 1]} : vector<2x128xf32> to vector<2x32xf32>
    %cst_96 = arith.constant 2.000000e+00 : f32
    %293 = vector.broadcast %cst_96 : f32 to vector<2x32xf32>
    %294 = arith.mulf %293, %292 : vector<2x32xf32>
    %cst_97 = arith.constant 1.000000e+00 : f32
    %295 = vector.broadcast %cst_97 : f32 to vector<2x32xf32>
    %296 = arith.subf %294, %295 : vector<2x32xf32>
    %297 = vector.extract_strided_slice %289 {offsets = [0, 96], sizes = [2, 32], strides = [1, 1]} : vector<2x128xf32> to vector<2x32xf32>
    %298 = arith.mulf %291, %236 : vector<2x32xf32>
    %299 = arith.mulf %290, %296 : vector<2x32xf32>
    %300 = arith.addf %298, %299 : vector<2x32xf32>
    %cst_98 = arith.constant 2.000000e+00 : f32
    %301 = vector.broadcast %cst_98 : f32 to vector<2x32xf32>
    %302 = arith.mulf %301, %300 : vector<2x32xf32>
    %303 = arith.negf %302 : vector<2x32xf32>
    %304 = math.exp %303 : vector<2x32xf32>
    %cst_99 = arith.constant 1.000000e+00 : f32
    %305 = vector.broadcast %cst_99 : f32 to vector<2x32xf32>
    %306 = arith.addf %305, %304 : vector<2x32xf32>
    %307 = arith.divf %305, %306 : vector<2x32xf32>
    %cst_100 = arith.constant 2.000000e+00 : f32
    %308 = vector.broadcast %cst_100 : f32 to vector<2x32xf32>
    %309 = arith.mulf %308, %307 : vector<2x32xf32>
    %cst_101 = arith.constant 1.000000e+00 : f32
    %310 = vector.broadcast %cst_101 : f32 to vector<2x32xf32>
    %311 = arith.subf %309, %310 : vector<2x32xf32>
    %312 = arith.mulf %297, %311 : vector<2x32xf32>
    %cst_102 = arith.constant dense<0.000000e+00> : vector<2x128xf32>
    %313 = tpu.matmul %312, %4, %cst_102 {dimension_numbers = #tpu.dot_dimension_numbers<[1], [0], [0], [1], [0, 0, 1, 1], [], []>} : vector<2x32xf32>, vector<32x128xf32>, vector<2x128xf32> -> vector<2x128xf32>
    %cst_103 = arith.constant dense<0.000000e+00> : vector<2x128xf32>
    %314 = tpu.matmul %280, %5, %cst_103 {dimension_numbers = #tpu.dot_dimension_numbers<[1], [0], [0], [1], [0, 0, 1, 1], [], []>} : vector<2x32xf32>, vector<32x128xf32>, vector<2x128xf32> -> vector<2x128xf32>
    %315 = arith.addf %313, %314 : vector<2x128xf32>
    %316 = arith.addf %315, %16 : vector<2x128xf32>
    %317 = arith.negf %316 : vector<2x128xf32>
    %318 = math.exp %317 : vector<2x128xf32>
    %cst_104 = arith.constant 1.000000e+00 : f32
    %319 = vector.broadcast %cst_104 : f32 to vector<2x128xf32>
    %320 = arith.addf %319, %318 : vector<2x128xf32>
    %321 = arith.divf %319, %320 : vector<2x128xf32>
    %322 = vector.extract_strided_slice %321 {offsets = [0, 0], sizes = [2, 32], strides = [1, 1]} : vector<2x128xf32> to vector<2x32xf32>
    %323 = vector.extract_strided_slice %321 {offsets = [0, 32], sizes = [2, 32], strides = [1, 1]} : vector<2x128xf32> to vector<2x32xf32>
    %324 = vector.extract_strided_slice %321 {offsets = [0, 64], sizes = [2, 32], strides = [1, 1]} : vector<2x128xf32> to vector<2x32xf32>
    %cst_105 = arith.constant 2.000000e+00 : f32
    %325 = vector.broadcast %cst_105 : f32 to vector<2x32xf32>
    %326 = arith.mulf %325, %324 : vector<2x32xf32>
    %cst_106 = arith.constant 1.000000e+00 : f32
    %327 = vector.broadcast %cst_106 : f32 to vector<2x32xf32>
    %328 = arith.subf %326, %327 : vector<2x32xf32>
    %329 = vector.extract_strided_slice %321 {offsets = [0, 96], sizes = [2, 32], strides = [1, 1]} : vector<2x128xf32> to vector<2x32xf32>
    %330 = arith.mulf %323, %268 : vector<2x32xf32>
    %331 = arith.mulf %322, %328 : vector<2x32xf32>
    %332 = arith.addf %330, %331 : vector<2x32xf32>
    %cst_107 = arith.constant 2.000000e+00 : f32
    %333 = vector.broadcast %cst_107 : f32 to vector<2x32xf32>
    %334 = arith.mulf %333, %332 : vector<2x32xf32>
    %335 = arith.negf %334 : vector<2x32xf32>
    %336 = math.exp %335 : vector<2x32xf32>
    %cst_108 = arith.constant 1.000000e+00 : f32
    %337 = vector.broadcast %cst_108 : f32 to vector<2x32xf32>
    %338 = arith.addf %337, %336 : vector<2x32xf32>
    %339 = arith.divf %337, %338 : vector<2x32xf32>
    %cst_109 = arith.constant 2.000000e+00 : f32
    %340 = vector.broadcast %cst_109 : f32 to vector<2x32xf32>
    %341 = arith.mulf %340, %339 : vector<2x32xf32>
    %cst_110 = arith.constant 1.000000e+00 : f32
    %342 = vector.broadcast %cst_110 : f32 to vector<2x32xf32>
    %343 = arith.subf %341, %342 : vector<2x32xf32>
    %344 = arith.mulf %329, %343 : vector<2x32xf32>
    %345 = vector.extract_strided_slice %13 {offsets = [0, 5, 0], sizes = [2, 1, 128], strides = [1, 1, 1]} : vector<2x8x128xf32> to vector<2x1x128xf32>
    %346 = vector.shape_cast %345 : vector<2x1x128xf32> to vector<2x128xf32>
    %cst_111 = arith.constant dense<0.000000e+00> : vector<2x128xf32>
    %347 = tpu.matmul %312, %3, %cst_111 {dimension_numbers = #tpu.dot_dimension_numbers<[1], [0], [0], [1], [0, 0, 1, 1], [], []>} : vector<2x32xf32>, vector<32x128xf32>, vector<2x128xf32> -> vector<2x128xf32>
    %348 = arith.addf %346, %347 : vector<2x128xf32>
    %349 = arith.negf %348 : vector<2x128xf32>
    %350 = math.exp %349 : vector<2x128xf32>
    %cst_112 = arith.constant 1.000000e+00 : f32
    %351 = vector.broadcast %cst_112 : f32 to vector<2x128xf32>
    %352 = arith.addf %351, %350 : vector<2x128xf32>
    %353 = arith.divf %351, %352 : vector<2x128xf32>
    %354 = vector.extract_strided_slice %353 {offsets = [0, 0], sizes = [2, 32], strides = [1, 1]} : vector<2x128xf32> to vector<2x32xf32>
    %355 = vector.extract_strided_slice %353 {offsets = [0, 32], sizes = [2, 32], strides = [1, 1]} : vector<2x128xf32> to vector<2x32xf32>
    %356 = vector.extract_strided_slice %353 {offsets = [0, 64], sizes = [2, 32], strides = [1, 1]} : vector<2x128xf32> to vector<2x32xf32>
    %cst_113 = arith.constant 2.000000e+00 : f32
    %357 = vector.broadcast %cst_113 : f32 to vector<2x32xf32>
    %358 = arith.mulf %357, %356 : vector<2x32xf32>
    %cst_114 = arith.constant 1.000000e+00 : f32
    %359 = vector.broadcast %cst_114 : f32 to vector<2x32xf32>
    %360 = arith.subf %358, %359 : vector<2x32xf32>
    %361 = vector.extract_strided_slice %353 {offsets = [0, 96], sizes = [2, 32], strides = [1, 1]} : vector<2x128xf32> to vector<2x32xf32>
    %362 = arith.mulf %355, %300 : vector<2x32xf32>
    %363 = arith.mulf %354, %360 : vector<2x32xf32>
    %364 = arith.addf %362, %363 : vector<2x32xf32>
    %cst_115 = arith.constant 2.000000e+00 : f32
    %365 = vector.broadcast %cst_115 : f32 to vector<2x32xf32>
    %366 = arith.mulf %365, %364 : vector<2x32xf32>
    %367 = arith.negf %366 : vector<2x32xf32>
    %368 = math.exp %367 : vector<2x32xf32>
    %cst_116 = arith.constant 1.000000e+00 : f32
    %369 = vector.broadcast %cst_116 : f32 to vector<2x32xf32>
    %370 = arith.addf %369, %368 : vector<2x32xf32>
    %371 = arith.divf %369, %370 : vector<2x32xf32>
    %cst_117 = arith.constant 2.000000e+00 : f32
    %372 = vector.broadcast %cst_117 : f32 to vector<2x32xf32>
    %373 = arith.mulf %372, %371 : vector<2x32xf32>
    %cst_118 = arith.constant 1.000000e+00 : f32
    %374 = vector.broadcast %cst_118 : f32 to vector<2x32xf32>
    %375 = arith.subf %373, %374 : vector<2x32xf32>
    %376 = arith.mulf %361, %375 : vector<2x32xf32>
    %cst_119 = arith.constant dense<0.000000e+00> : vector<2x128xf32>
    %377 = tpu.matmul %376, %4, %cst_119 {dimension_numbers = #tpu.dot_dimension_numbers<[1], [0], [0], [1], [0, 0, 1, 1], [], []>} : vector<2x32xf32>, vector<32x128xf32>, vector<2x128xf32> -> vector<2x128xf32>
    %cst_120 = arith.constant dense<0.000000e+00> : vector<2x128xf32>
    %378 = tpu.matmul %344, %5, %cst_120 {dimension_numbers = #tpu.dot_dimension_numbers<[1], [0], [0], [1], [0, 0, 1, 1], [], []>} : vector<2x32xf32>, vector<32x128xf32>, vector<2x128xf32> -> vector<2x128xf32>
    %379 = arith.addf %377, %378 : vector<2x128xf32>
    %380 = arith.addf %379, %16 : vector<2x128xf32>
    %381 = arith.negf %380 : vector<2x128xf32>
    %382 = math.exp %381 : vector<2x128xf32>
    %cst_121 = arith.constant 1.000000e+00 : f32
    %383 = vector.broadcast %cst_121 : f32 to vector<2x128xf32>
    %384 = arith.addf %383, %382 : vector<2x128xf32>
    %385 = arith.divf %383, %384 : vector<2x128xf32>
    %386 = vector.extract_strided_slice %385 {offsets = [0, 0], sizes = [2, 32], strides = [1, 1]} : vector<2x128xf32> to vector<2x32xf32>
    %387 = vector.extract_strided_slice %385 {offsets = [0, 32], sizes = [2, 32], strides = [1, 1]} : vector<2x128xf32> to vector<2x32xf32>
    %388 = vector.extract_strided_slice %385 {offsets = [0, 64], sizes = [2, 32], strides = [1, 1]} : vector<2x128xf32> to vector<2x32xf32>
    %cst_122 = arith.constant 2.000000e+00 : f32
    %389 = vector.broadcast %cst_122 : f32 to vector<2x32xf32>
    %390 = arith.mulf %389, %388 : vector<2x32xf32>
    %cst_123 = arith.constant 1.000000e+00 : f32
    %391 = vector.broadcast %cst_123 : f32 to vector<2x32xf32>
    %392 = arith.subf %390, %391 : vector<2x32xf32>
    %393 = vector.extract_strided_slice %385 {offsets = [0, 96], sizes = [2, 32], strides = [1, 1]} : vector<2x128xf32> to vector<2x32xf32>
    %394 = arith.mulf %387, %332 : vector<2x32xf32>
    %395 = arith.mulf %386, %392 : vector<2x32xf32>
    %396 = arith.addf %394, %395 : vector<2x32xf32>
    %cst_124 = arith.constant 2.000000e+00 : f32
    %397 = vector.broadcast %cst_124 : f32 to vector<2x32xf32>
    %398 = arith.mulf %397, %396 : vector<2x32xf32>
    %399 = arith.negf %398 : vector<2x32xf32>
    %400 = math.exp %399 : vector<2x32xf32>
    %cst_125 = arith.constant 1.000000e+00 : f32
    %401 = vector.broadcast %cst_125 : f32 to vector<2x32xf32>
    %402 = arith.addf %401, %400 : vector<2x32xf32>
    %403 = arith.divf %401, %402 : vector<2x32xf32>
    %cst_126 = arith.constant 2.000000e+00 : f32
    %404 = vector.broadcast %cst_126 : f32 to vector<2x32xf32>
    %405 = arith.mulf %404, %403 : vector<2x32xf32>
    %cst_127 = arith.constant 1.000000e+00 : f32
    %406 = vector.broadcast %cst_127 : f32 to vector<2x32xf32>
    %407 = arith.subf %405, %406 : vector<2x32xf32>
    %408 = arith.mulf %393, %407 : vector<2x32xf32>
    %409 = vector.extract_strided_slice %13 {offsets = [0, 6, 0], sizes = [2, 1, 128], strides = [1, 1, 1]} : vector<2x8x128xf32> to vector<2x1x128xf32>
    %410 = vector.shape_cast %409 : vector<2x1x128xf32> to vector<2x128xf32>
    %cst_128 = arith.constant dense<0.000000e+00> : vector<2x128xf32>
    %411 = tpu.matmul %376, %3, %cst_128 {dimension_numbers = #tpu.dot_dimension_numbers<[1], [0], [0], [1], [0, 0, 1, 1], [], []>} : vector<2x32xf32>, vector<32x128xf32>, vector<2x128xf32> -> vector<2x128xf32>
    %412 = arith.addf %410, %411 : vector<2x128xf32>
    %413 = arith.negf %412 : vector<2x128xf32>
    %414 = math.exp %413 : vector<2x128xf32>
    %cst_129 = arith.constant 1.000000e+00 : f32
    %415 = vector.broadcast %cst_129 : f32 to vector<2x128xf32>
    %416 = arith.addf %415, %414 : vector<2x128xf32>
    %417 = arith.divf %415, %416 : vector<2x128xf32>
    %418 = vector.extract_strided_slice %417 {offsets = [0, 0], sizes = [2, 32], strides = [1, 1]} : vector<2x128xf32> to vector<2x32xf32>
    %419 = vector.extract_strided_slice %417 {offsets = [0, 32], sizes = [2, 32], strides = [1, 1]} : vector<2x128xf32> to vector<2x32xf32>
    %420 = vector.extract_strided_slice %417 {offsets = [0, 64], sizes = [2, 32], strides = [1, 1]} : vector<2x128xf32> to vector<2x32xf32>
    %cst_130 = arith.constant 2.000000e+00 : f32
    %421 = vector.broadcast %cst_130 : f32 to vector<2x32xf32>
    %422 = arith.mulf %421, %420 : vector<2x32xf32>
    %cst_131 = arith.constant 1.000000e+00 : f32
    %423 = vector.broadcast %cst_131 : f32 to vector<2x32xf32>
    %424 = arith.subf %422, %423 : vector<2x32xf32>
    %425 = vector.extract_strided_slice %417 {offsets = [0, 96], sizes = [2, 32], strides = [1, 1]} : vector<2x128xf32> to vector<2x32xf32>
    %426 = arith.mulf %419, %364 : vector<2x32xf32>
    %427 = arith.mulf %418, %424 : vector<2x32xf32>
    %428 = arith.addf %426, %427 : vector<2x32xf32>
    %cst_132 = arith.constant 2.000000e+00 : f32
    %429 = vector.broadcast %cst_132 : f32 to vector<2x32xf32>
    %430 = arith.mulf %429, %428 : vector<2x32xf32>
    %431 = arith.negf %430 : vector<2x32xf32>
    %432 = math.exp %431 : vector<2x32xf32>
    %cst_133 = arith.constant 1.000000e+00 : f32
    %433 = vector.broadcast %cst_133 : f32 to vector<2x32xf32>
    %434 = arith.addf %433, %432 : vector<2x32xf32>
    %435 = arith.divf %433, %434 : vector<2x32xf32>
    %cst_134 = arith.constant 2.000000e+00 : f32
    %436 = vector.broadcast %cst_134 : f32 to vector<2x32xf32>
    %437 = arith.mulf %436, %435 : vector<2x32xf32>
    %cst_135 = arith.constant 1.000000e+00 : f32
    %438 = vector.broadcast %cst_135 : f32 to vector<2x32xf32>
    %439 = arith.subf %437, %438 : vector<2x32xf32>
    %440 = arith.mulf %425, %439 : vector<2x32xf32>
    %cst_136 = arith.constant dense<0.000000e+00> : vector<2x128xf32>
    %441 = tpu.matmul %440, %4, %cst_136 {dimension_numbers = #tpu.dot_dimension_numbers<[1], [0], [0], [1], [0, 0, 1, 1], [], []>} : vector<2x32xf32>, vector<32x128xf32>, vector<2x128xf32> -> vector<2x128xf32>
    %cst_137 = arith.constant dense<0.000000e+00> : vector<2x128xf32>
    %442 = tpu.matmul %408, %5, %cst_137 {dimension_numbers = #tpu.dot_dimension_numbers<[1], [0], [0], [1], [0, 0, 1, 1], [], []>} : vector<2x32xf32>, vector<32x128xf32>, vector<2x128xf32> -> vector<2x128xf32>
    %443 = arith.addf %441, %442 : vector<2x128xf32>
    %444 = arith.addf %443, %16 : vector<2x128xf32>
    %445 = arith.negf %444 : vector<2x128xf32>
    %446 = math.exp %445 : vector<2x128xf32>
    %cst_138 = arith.constant 1.000000e+00 : f32
    %447 = vector.broadcast %cst_138 : f32 to vector<2x128xf32>
    %448 = arith.addf %447, %446 : vector<2x128xf32>
    %449 = arith.divf %447, %448 : vector<2x128xf32>
    %450 = vector.extract_strided_slice %449 {offsets = [0, 0], sizes = [2, 32], strides = [1, 1]} : vector<2x128xf32> to vector<2x32xf32>
    %451 = vector.extract_strided_slice %449 {offsets = [0, 32], sizes = [2, 32], strides = [1, 1]} : vector<2x128xf32> to vector<2x32xf32>
    %452 = vector.extract_strided_slice %449 {offsets = [0, 64], sizes = [2, 32], strides = [1, 1]} : vector<2x128xf32> to vector<2x32xf32>
    %cst_139 = arith.constant 2.000000e+00 : f32
    %453 = vector.broadcast %cst_139 : f32 to vector<2x32xf32>
    %454 = arith.mulf %453, %452 : vector<2x32xf32>
    %cst_140 = arith.constant 1.000000e+00 : f32
    %455 = vector.broadcast %cst_140 : f32 to vector<2x32xf32>
    %456 = arith.subf %454, %455 : vector<2x32xf32>
    %457 = vector.extract_strided_slice %449 {offsets = [0, 96], sizes = [2, 32], strides = [1, 1]} : vector<2x128xf32> to vector<2x32xf32>
    %458 = arith.mulf %451, %396 : vector<2x32xf32>
    %459 = arith.mulf %450, %456 : vector<2x32xf32>
    %460 = arith.addf %458, %459 : vector<2x32xf32>
    %cst_141 = arith.constant 2.000000e+00 : f32
    %461 = vector.broadcast %cst_141 : f32 to vector<2x32xf32>
    %462 = arith.mulf %461, %460 : vector<2x32xf32>
    %463 = arith.negf %462 : vector<2x32xf32>
    %464 = math.exp %463 : vector<2x32xf32>
    %cst_142 = arith.constant 1.000000e+00 : f32
    %465 = vector.broadcast %cst_142 : f32 to vector<2x32xf32>
    %466 = arith.addf %465, %464 : vector<2x32xf32>
    %467 = arith.divf %465, %466 : vector<2x32xf32>
    %cst_143 = arith.constant 2.000000e+00 : f32
    %468 = vector.broadcast %cst_143 : f32 to vector<2x32xf32>
    %469 = arith.mulf %468, %467 : vector<2x32xf32>
    %cst_144 = arith.constant 1.000000e+00 : f32
    %470 = vector.broadcast %cst_144 : f32 to vector<2x32xf32>
    %471 = arith.subf %469, %470 : vector<2x32xf32>
    %472 = arith.mulf %457, %471 : vector<2x32xf32>
    %473 = vector.extract_strided_slice %13 {offsets = [0, 7, 0], sizes = [2, 1, 128], strides = [1, 1, 1]} : vector<2x8x128xf32> to vector<2x1x128xf32>
    %474 = vector.shape_cast %473 : vector<2x1x128xf32> to vector<2x128xf32>
    %cst_145 = arith.constant dense<0.000000e+00> : vector<2x128xf32>
    %475 = tpu.matmul %440, %3, %cst_145 {dimension_numbers = #tpu.dot_dimension_numbers<[1], [0], [0], [1], [0, 0, 1, 1], [], []>} : vector<2x32xf32>, vector<32x128xf32>, vector<2x128xf32> -> vector<2x128xf32>
    %476 = arith.addf %474, %475 : vector<2x128xf32>
    %477 = arith.negf %476 : vector<2x128xf32>
    %478 = math.exp %477 : vector<2x128xf32>
    %cst_146 = arith.constant 1.000000e+00 : f32
    %479 = vector.broadcast %cst_146 : f32 to vector<2x128xf32>
    %480 = arith.addf %479, %478 : vector<2x128xf32>
    %481 = arith.divf %479, %480 : vector<2x128xf32>
    %482 = vector.extract_strided_slice %481 {offsets = [0, 0], sizes = [2, 32], strides = [1, 1]} : vector<2x128xf32> to vector<2x32xf32>
    %483 = vector.extract_strided_slice %481 {offsets = [0, 32], sizes = [2, 32], strides = [1, 1]} : vector<2x128xf32> to vector<2x32xf32>
    %484 = vector.extract_strided_slice %481 {offsets = [0, 64], sizes = [2, 32], strides = [1, 1]} : vector<2x128xf32> to vector<2x32xf32>
    %cst_147 = arith.constant 2.000000e+00 : f32
    %485 = vector.broadcast %cst_147 : f32 to vector<2x32xf32>
    %486 = arith.mulf %485, %484 : vector<2x32xf32>
    %cst_148 = arith.constant 1.000000e+00 : f32
    %487 = vector.broadcast %cst_148 : f32 to vector<2x32xf32>
    %488 = arith.subf %486, %487 : vector<2x32xf32>
    %489 = vector.extract_strided_slice %481 {offsets = [0, 96], sizes = [2, 32], strides = [1, 1]} : vector<2x128xf32> to vector<2x32xf32>
    %490 = arith.mulf %483, %428 : vector<2x32xf32>
    %491 = arith.mulf %482, %488 : vector<2x32xf32>
    %492 = arith.addf %490, %491 : vector<2x32xf32>
    %cst_149 = arith.constant 2.000000e+00 : f32
    %493 = vector.broadcast %cst_149 : f32 to vector<2x32xf32>
    %494 = arith.mulf %493, %492 : vector<2x32xf32>
    %495 = arith.negf %494 : vector<2x32xf32>
    %496 = math.exp %495 : vector<2x32xf32>
    %cst_150 = arith.constant 1.000000e+00 : f32
    %497 = vector.broadcast %cst_150 : f32 to vector<2x32xf32>
    %498 = arith.addf %497, %496 : vector<2x32xf32>
    %499 = arith.divf %497, %498 : vector<2x32xf32>
    %cst_151 = arith.constant 2.000000e+00 : f32
    %500 = vector.broadcast %cst_151 : f32 to vector<2x32xf32>
    %501 = arith.mulf %500, %499 : vector<2x32xf32>
    %cst_152 = arith.constant 1.000000e+00 : f32
    %502 = vector.broadcast %cst_152 : f32 to vector<2x32xf32>
    %503 = arith.subf %501, %502 : vector<2x32xf32>
    %504 = arith.mulf %489, %503 : vector<2x32xf32>
    %cst_153 = arith.constant dense<0.000000e+00> : vector<2x128xf32>
    %505 = tpu.matmul %504, %4, %cst_153 {dimension_numbers = #tpu.dot_dimension_numbers<[1], [0], [0], [1], [0, 0, 1, 1], [], []>} : vector<2x32xf32>, vector<32x128xf32>, vector<2x128xf32> -> vector<2x128xf32>
    %cst_154 = arith.constant dense<0.000000e+00> : vector<2x128xf32>
    %506 = tpu.matmul %472, %5, %cst_154 {dimension_numbers = #tpu.dot_dimension_numbers<[1], [0], [0], [1], [0, 0, 1, 1], [], []>} : vector<2x32xf32>, vector<32x128xf32>, vector<2x128xf32> -> vector<2x128xf32>
    %507 = arith.addf %505, %506 : vector<2x128xf32>
    %508 = arith.addf %507, %16 : vector<2x128xf32>
    %509 = arith.negf %508 : vector<2x128xf32>
    %510 = math.exp %509 : vector<2x128xf32>
    %cst_155 = arith.constant 1.000000e+00 : f32
    %511 = vector.broadcast %cst_155 : f32 to vector<2x128xf32>
    %512 = arith.addf %511, %510 : vector<2x128xf32>
    %513 = arith.divf %511, %512 : vector<2x128xf32>
    %514 = vector.extract_strided_slice %513 {offsets = [0, 0], sizes = [2, 32], strides = [1, 1]} : vector<2x128xf32> to vector<2x32xf32>
    %515 = vector.extract_strided_slice %513 {offsets = [0, 32], sizes = [2, 32], strides = [1, 1]} : vector<2x128xf32> to vector<2x32xf32>
    %516 = vector.extract_strided_slice %513 {offsets = [0, 64], sizes = [2, 32], strides = [1, 1]} : vector<2x128xf32> to vector<2x32xf32>
    %cst_156 = arith.constant 2.000000e+00 : f32
    %517 = vector.broadcast %cst_156 : f32 to vector<2x32xf32>
    %518 = arith.mulf %517, %516 : vector<2x32xf32>
    %cst_157 = arith.constant 1.000000e+00 : f32
    %519 = vector.broadcast %cst_157 : f32 to vector<2x32xf32>
    %520 = arith.subf %518, %519 : vector<2x32xf32>
    %521 = vector.extract_strided_slice %513 {offsets = [0, 96], sizes = [2, 32], strides = [1, 1]} : vector<2x128xf32> to vector<2x32xf32>
    %522 = arith.mulf %515, %460 : vector<2x32xf32>
    %523 = arith.mulf %514, %520 : vector<2x32xf32>
    %524 = arith.addf %522, %523 : vector<2x32xf32>
    %cst_158 = arith.constant 2.000000e+00 : f32
    %525 = vector.broadcast %cst_158 : f32 to vector<2x32xf32>
    %526 = arith.mulf %525, %524 : vector<2x32xf32>
    %527 = arith.negf %526 : vector<2x32xf32>
    %528 = math.exp %527 : vector<2x32xf32>
    %cst_159 = arith.constant 1.000000e+00 : f32
    %529 = vector.broadcast %cst_159 : f32 to vector<2x32xf32>
    %530 = arith.addf %529, %528 : vector<2x32xf32>
    %531 = arith.divf %529, %530 : vector<2x32xf32>
    %cst_160 = arith.constant 2.000000e+00 : f32
    %532 = vector.broadcast %cst_160 : f32 to vector<2x32xf32>
    %533 = arith.mulf %532, %531 : vector<2x32xf32>
    %cst_161 = arith.constant 1.000000e+00 : f32
    %534 = vector.broadcast %cst_161 : f32 to vector<2x32xf32>
    %535 = arith.subf %533, %534 : vector<2x32xf32>
    %536 = arith.mulf %521, %535 : vector<2x32xf32>
    %c0_162 = arith.constant 0 : index
    %c0_163 = arith.constant 0 : index
    %c0_164 = arith.constant 0 : index
    %537 = vector.load %arg13[%c0_162, %c0_163, %c0_164] : memref<2x2x32xf32, #tpu.memory_space<vmem>>, vector<1x2x32xf32>
    %538 = vector.shape_cast %537 : vector<1x2x32xf32> to vector<2x32xf32>
    %539 = vector.shape_cast %504 : vector<2x32xf32> to vector<1x2x32xf32>
    tpu.vector_store %arg13[%c0_162, %c0_163, %c0_164], %539 {strides = array<i32>} : memref<2x2x32xf32, #tpu.memory_space<vmem>>, vector<1x2x32xf32>,
    %c0_165 = arith.constant 0 : index
    %c0_166 = arith.constant 0 : index
    %c0_167 = arith.constant 0 : index
    %540 = vector.load %arg14[%c0_165, %c0_166, %c0_167] : memref<2x2x32xf32, #tpu.memory_space<vmem>>, vector<1x2x32xf32>
    %541 = vector.shape_cast %540 : vector<1x2x32xf32> to vector<2x32xf32>
    %542 = vector.shape_cast %492 : vector<2x32xf32> to vector<1x2x32xf32>
    tpu.vector_store %arg14[%c0_165, %c0_166, %c0_167], %542 {strides = array<i32>} : memref<2x2x32xf32, #tpu.memory_space<vmem>>, vector<1x2x32xf32>,
    %c1_168 = arith.constant 1 : index
    %c0_169 = arith.constant 0 : index
    %c0_170 = arith.constant 0 : index
    %543 = vector.load %arg13[%c1_168, %c0_169, %c0_170] : memref<2x2x32xf32, #tpu.memory_space<vmem>>, vector<1x2x32xf32>
    %544 = vector.shape_cast %543 : vector<1x2x32xf32> to vector<2x32xf32>
    %545 = vector.shape_cast %536 : vector<2x32xf32> to vector<1x2x32xf32>
    tpu.vector_store %arg13[%c1_168, %c0_169, %c0_170], %545 {strides = array<i32>} : memref<2x2x32xf32, #tpu.memory_space<vmem>>, vector<1x2x32xf32>,
    %c1_171 = arith.constant 1 : index
    %c0_172 = arith.constant 0 : index
    %c0_173 = arith.constant 0 : index
    %546 = vector.load %arg14[%c1_171, %c0_172, %c0_173] : memref<2x2x32xf32, #tpu.memory_space<vmem>>, vector<1x2x32xf32>
    %547 = vector.shape_cast %546 : vector<1x2x32xf32> to vector<2x32xf32>
    %548 = vector.shape_cast %524 : vector<2x32xf32> to vector<1x2x32xf32>
    tpu.vector_store %arg14[%c1_171, %c0_172, %c0_173], %548 {strides = array<i32>} : memref<2x2x32xf32, #tpu.memory_space<vmem>>, vector<1x2x32xf32>,
    %549 = vector.shape_cast %88 : vector<2x32xf32> to vector<2x1x32xf32>
    %550 = vector.shape_cast %152 : vector<2x32xf32> to vector<2x1x32xf32>
    %551 = vector.shape_cast %216 : vector<2x32xf32> to vector<2x1x32xf32>
    %552 = vector.shape_cast %280 : vector<2x32xf32> to vector<2x1x32xf32>
    %553 = vector.shape_cast %344 : vector<2x32xf32> to vector<2x1x32xf32>
    %554 = vector.shape_cast %408 : vector<2x32xf32> to vector<2x1x32xf32>
    %555 = vector.shape_cast %472 : vector<2x32xf32> to vector<2x1x32xf32>
    %556 = vector.shape_cast %536 : vector<2x32xf32> to vector<2x1x32xf32>
    %557 = tpu.concatenate %549, %550, %551, %552, %553, %554, %555, %556 in 1 : vector<2x1x32xf32>, vector<2x1x32xf32>, vector<2x1x32xf32>, vector<2x1x32xf32>, vector<2x1x32xf32>, vector<2x1x32xf32>, vector<2x1x32xf32>, vector<2x1x32xf32> -> vector<2x8x32xf32>
    %558 = vector.shape_cast %557 : vector<2x8x32xf32> to vector<16x32xf32>
    %c0_174 = arith.constant 0 : index
    %c0_175 = arith.constant 0 : index
    %559 = vector.load %arg10[%c0_174, %c0_175] : memref<32x4xf32, #tpu.memory_space<vmem>>, vector<32x4xf32>
    %cst_176 = arith.constant dense<0.000000e+00> : vector<16x4xf32>
    %560 = tpu.matmul %558, %559, %cst_176 {dimension_numbers = #tpu.dot_dimension_numbers<[1], [0], [0], [1], [0, 0, 1, 1], [], []>} : vector<16x32xf32>, vector<32x4xf32>, vector<16x4xf32> -> vector<16x4xf32>
    %c0_177 = arith.constant 0 : index
    %c0_178 = arith.constant 0 : index
    %561 = vector.load %arg11[%c0_177, %c0_178] : memref<1x4xf32, #tpu.memory_space<vmem>>, vector<1x4xf32>
    %562 = vector.broadcast %561 : vector<1x4xf32> to vector<16x4xf32>
    %563 = arith.addf %560, %562 : vector<16x4xf32>
    %564 = vector.shape_cast %563 : vector<16x4xf32> to vector<2x8x4xf32>
    %c0_179 = arith.constant 0 : index
    %c0_180 = arith.constant 0 : index
    %c0_181 = arith.constant 0 : index
    %565 = vector.load %arg12[%c0_179, %c0_180, %c0_181] : memref<2x8x4xf32, #tpu.memory_space<vmem>>, vector<2x8x4xf32>
    tpu.vector_store %arg12[%c0_179, %c0_180, %c0_181], %564 {strides = array<i32>} : memref<2x8x4xf32, #tpu.memory_space<vmem>>, vector<2x8x4xf32>,
    return
  }
  func.func @transform_0(%arg0: i32) -> (i32, i32, i32) {
    %c0_i32 = arith.constant 0 : i32
    %c0_i32_0 = arith.constant 0 : i32
    %c0_i32_1 = arith.constant 0 : i32
    return %c0_i32, %arg0, %c0_i32_0 : i32, i32, i32
  }
  func.func @transform_1(%arg0: i32) -> (i32, i32, i32) {
    %c0_i32 = arith.constant 0 : i32
    %c0_i32_0 = arith.constant 0 : i32
    %c0_i32_1 = arith.constant 0 : i32
    %c0_i32_2 = arith.constant 0 : i32
    return %c0_i32, %c0_i32_0, %c0_i32_1 : i32, i32, i32
  }
  func.func @transform_2(%arg0: i32) -> (i32, i32, i32) {
    %c0_i32 = arith.constant 0 : i32
    %c0_i32_0 = arith.constant 0 : i32
    %c0_i32_1 = arith.constant 0 : i32
    %c0_i32_2 = arith.constant 0 : i32
    return %c0_i32, %c0_i32_0, %c0_i32_1 : i32, i32, i32
  }
  func.func @transform_3(%arg0: i32) -> (i32, i32) {
    %c0_i32 = arith.constant 0 : i32
    %c0_i32_0 = arith.constant 0 : i32
    %c0_i32_1 = arith.constant 0 : i32
    return %c0_i32, %c0_i32_0 : i32, i32
  }
  func.func @transform_4(%arg0: i32) -> (i32, i32) {
    %c0_i32 = arith.constant 0 : i32
    %c0_i32_0 = arith.constant 0 : i32
    %c0_i32_1 = arith.constant 0 : i32
    return %c0_i32, %c0_i32_0 : i32, i32
  }
  func.func @transform_5(%arg0: i32) -> (i32, i32) {
    %c0_i32 = arith.constant 0 : i32
    %c0_i32_0 = arith.constant 0 : i32
    %c0_i32_1 = arith.constant 0 : i32
    return %c0_i32, %c0_i32_0 : i32, i32
  }
  func.func @transform_6(%arg0: i32) -> (i32, i32) {
    %c0_i32 = arith.constant 0 : i32
    %c0_i32_0 = arith.constant 0 : i32
    %c0_i32_1 = arith.constant 0 : i32
    return %c0_i32, %c0_i32_0 : i32, i32
  }
  func.func @transform_7(%arg0: i32) -> (i32, i32) {
    %c0_i32 = arith.constant 0 : i32
    %c0_i32_0 = arith.constant 0 : i32
    %c0_i32_1 = arith.constant 0 : i32
    return %c0_i32, %c0_i32_0 : i32, i32
  }
  func.func @transform_8(%arg0: i32) -> (i32, i32) {
    %c0_i32 = arith.constant 0 : i32
    %c0_i32_0 = arith.constant 0 : i32
    %c0_i32_1 = arith.constant 0 : i32
    return %c0_i32, %c0_i32_0 : i32, i32
  }
  func.func @transform_9(%arg0: i32) -> (i32, i32) {
    %c0_i32 = arith.constant 0 : i32
    %c0_i32_0 = arith.constant 0 : i32
    %c0_i32_1 = arith.constant 0 : i32
    return %c0_i32, %c0_i32_0 : i32, i32
  }
  func.func @transform_10(%arg0: i32) -> (i32, i32) {
    %c0_i32 = arith.constant 0 : i32
    %c0_i32_0 = arith.constant 0 : i32
    %c0_i32_1 = arith.constant 0 : i32
    return %c0_i32, %c0_i32_0 : i32, i32
  }
  func.func @transform_11(%arg0: i32) -> (i32, i32, i32) {
    %c0_i32 = arith.constant 0 : i32
    %c0_i32_0 = arith.constant 0 : i32
    %c0_i32_1 = arith.constant 0 : i32
    return %c0_i32, %arg0, %c0_i32_0 : i32, i32, i32
  }
}

</mosaic_0001>

<bundles_post_ra>
// kernel: tpu_custom_call.1
= control target key start
LH: loop header
LB: loop body
LE: loop exit
PB: predicated region body
PF: predicated region fallthrough
CT: control target
= control target key end

     0   :  { %16 = vsyncpa [#allocation5], 0  ;;  %s5167_s0 = inlined_call_operand.vmem [shape: f32[2,8,4], index: 0, kind: input, shape index: {}]   ;;  %s5168_s1 = inlined_call_operand.hbm [shape: f32[2,2,32], index: 1, kind: input, shape index: {}]   ;;  %s5169_s2 = inlined_call_operand.hbm [shape: f32[2,2,32], index: 2, kind: input, shape index: {}]   ;;  %s5170_s3 = inlined_call_operand.hbm [shape: f32[4,128], index: 3, kind: input, shape index: {}]   ;;  %s5171_s4 = inlined_call_operand.vmem [shape: f32[32,128], index: 4, kind: input, shape index: {}]   ;;  %s5172_s5 = inlined_call_operand.vmem [shape: f32[1,128], index: 5, kind: input, shape index: {}]   ;;  %s5173_s6 = inlined_call_operand.vmem [shape: f32[32,128], index: 6, kind: input, shape index: {}]   ;;  %s5174_s7 = inlined_call_operand.hbm [shape: f32[32,128], index: 7, kind: input, shape index: {}]   ;;  %s5175_s8 = inlined_call_operand.vmem [shape: f32[1,128], index: 8, kind: input, shape index: {}]   ;;  %s5176_s9 = inlined_call_operand.vmem [shape: f32[32,4], index: 9, kind: input, shape index: {}]   ;;  %s5177_s10 = inlined_call_operand.vmem [shape: f32[1,4], index: 10, kind: input, shape index: {}]   ;;  %s5178_s11 = inlined_call_operand.vmem [shape: f32[2,8,4], index: 11, kind: output, shape index: {}]  }
   0x1   :  { %17 = vsyncpa [#allocation7], 0 }
   0x2   :  { %18 = vsyncpa [#allocation10], 0  ;;  %s4322_s17 = smov [#allocation6]   ;;  %s4323_s19 = smov [#allocation4]  }
   0x3   :  { %s38_s18 = sshll.u32 %s4322_s17, 4  ;;  %s26_s20 = sshll.u32 %s4323_s19, 4  ;;  %s39_s18 = int_to_ptr.vmem [resolvable:$true] %s38_s18  ;;  %s4396_s20 = int_to_ptr.vmem [resolvable:$true] %s26_s20 }
   0x4   :  { %s4228_s23 = scalar_lea.hbm %s5169_s2, 64 }
   0x5   :  { %p4229_p0 = scmp.ne.s32.totalorder %s5169_s2, %s4228_s23  ;;  %p4232_p1 = scmp.lt.u32.totalorder %s4228_s23, %s5169_s2 }
   0x7   :  { %p4234_p2 = pnand %p4232_p1, %p4229_p0 }
   0x9   :  { %4237 = shalt.err (!%p4234_p2)
}
   0xa   :  { %s4238_s28 = scalar_lea.vmem %s39_s18, 64  ;;  %p4243_p4 = scmp.lt.s32.totalorder %s39_s18, %s39_s18 }
   0xb   :  { %p4239_p3 = scmp.ne.s32.totalorder %s39_s18, %s4238_s28  ;;  %p4244_p5 = scmp.lt.s32.totalorder %s4238_s28, %s4238_s28 }
   0xd   :  { %p4245_p6 = por %p4244_p5, %p4243_p4 }
   0xf   :  { %p4246_p7 = pnand %p4245_p6, %p4239_p3 }
  0x11   :  { %4249 = shalt.err (!%p4246_p7)
}
  0x12   :  { %s4324_s29 = smov 32   ;;  %s4325_s30 = smov 2  }
  0x13   :  { %44 = dma.hbm_to_vmem [thread:$0]  %s5169_s2, 64, %s39_s18, [#allocation7], %s4324_s29, %s4324_s29, %s4325_s30  }
  0x14   :  { %s4250_s16 = scalar_lea.hbm %s5168_s1, 64 }
  0x15   :  { %p4251_p8 = scmp.ne.s32.totalorder %s5168_s1, %s4250_s16  ;;  %p4254_p9 = scmp.lt.u32.totalorder %s4250_s16, %s5168_s1 }
  0x17   :  { %p4256_p10 = pnand %p4254_p9, %p4251_p8 }
  0x19   :  { %4259 = shalt.err (!%p4256_p10)
}
  0x1a   :  { %s4260_s23 = scalar_lea.vmem %s4396_s20, 64  ;;  %p4265_p12 = scmp.lt.s32.totalorder %s4396_s20, %s4396_s20 }
  0x1b   :  { %p4261_p11 = scmp.ne.s32.totalorder %s4396_s20, %s4260_s23  ;;  %p4266_p13 = scmp.lt.s32.totalorder %s4260_s23, %s4260_s23 }
  0x1d   :  { %p4267_p0 = por %p4266_p13, %p4265_p12 }
  0x1f   :  { %p4268_p1 = pnand %p4267_p0, %p4261_p11 }
  0x21   :  { %4271 = shalt.err (!%p4268_p1)
}
  0x22   :  { %32 = dma.hbm_to_vmem [thread:$0]  %s5168_s1, 64, %s4396_s20, [#allocation5], %s4324_s29, %s4324_s29, %s4325_s30  }
  0x23   :  { %s4326_s24 = smov [#allocation8]   ;;  %s4327_s26 = smov [#allocation9]  }
  0x24   :  { %s51_s25 = sshll.u32 %s4326_s24, 4  ;;  %s66_s27 = sshll.u32 %s4327_s26, 4  ;;  %s52_s25 = int_to_ptr.vmem [resolvable:$true] %s51_s25  ;;  %s4431_s27 = int_to_ptr.vmem [resolvable:$true] %s66_s27 }
  0x25   :  { %s4272_s13 = scalar_lea.hbm %s5170_s3, 64 }
  0x26   :  { %p4273_p2 = scmp.ne.s32.totalorder %s5170_s3, %s4272_s13  ;;  %p4276_p3 = scmp.lt.u32.totalorder %s4272_s13, %s5170_s3 }
  0x28   :  { %p4278_p4 = pnand %p4276_p3, %p4273_p2 }
  0x2a   :  { %4281 = shalt.err (!%p4278_p4)
}
  0x2b   :  { %s4282_s1 = scalar_lea.vmem %s52_s25, 64  ;;  %p4287_p6 = scmp.lt.s32.totalorder %s52_s25, %s52_s25 }
  0x2c   :  { %p4283_p5 = scmp.ne.s32.totalorder %s52_s25, %s4282_s1  ;;  %p4288_p7 = scmp.lt.s32.totalorder %s4282_s1, %s4282_s1 }
  0x2e   :  { %p4289_p8 = por %p4288_p7, %p4287_p6 }
  0x30   :  { %p4290_p9 = pnand %p4289_p8, %p4283_p5 }
  0x32   :  { %4293 = shalt.err (!%p4290_p9)
}
  0x33   :  { %54 = dma.hbm_to_vmem [thread:$0]  %s5170_s3, 64, %s52_s25, [#allocation7]  }
  0x34   :  { %s4294_s22 = scalar_lea.hbm %s5174_s7, 512 }
  0x35   :  { %p4295_p10 = scmp.ne.s32.totalorder %s5174_s7, %s4294_s22  ;;  %p4298_p11 = scmp.lt.u32.totalorder %s4294_s22, %s5174_s7 }
  0x37   :  { %p4300_p12 = pnand %p4298_p11, %p4295_p10 }
  0x39   :  { %4303 = shalt.err (!%p4300_p12)
}
  0x3a   :  { %s4304_s26 = scalar_lea.vmem %s4431_s27, 512  ;;  %p4309_p0 = scmp.lt.s32.totalorder %s4431_s27, %s4431_s27 }
  0x3b   :  { %p4305_p13 = scmp.ne.s32.totalorder %s4431_s27, %s4304_s26  ;;  %p4310_p1 = scmp.lt.s32.totalorder %s4304_s26, %s4304_s26 }
  0x3d   :  { %p4311_p2 = por %p4310_p1, %p4309_p0 }
  0x3f   :  { %p4312_p3 = pnand %p4311_p2, %p4305_p13 }
  0x41   :  { %4315 = shalt.err (!%p4312_p3)
}
  0x42   :  { %s4328_s3 = smov 128   ;;  %s4329_s25 = smov 8  }
  0x43   :  { %72 = dma.hbm_to_vmem [thread:$0]  %s5174_s7, 512, %s4431_s27, [#allocation10], %s4328_s3, %s4328_s3, %s4329_s25  }
  0x44   :  { %4316 = dma.done.wait [#allocation5], 64  }
  0x45   :  { %4317 = vsyncadd [#allocation5], 4294967232 }
  0x46   :  { %4318 = dma.done.wait [#allocation7], 128  }
  0x47   :  { %4319 = vsyncadd [#allocation7], 4294967168 }
  0x48   :  { %4320 = dma.done.wait [#allocation10], 512  }
  0x49   :  { %4321 = vsyncadd [#allocation10], 4294966784  ;;  %v4330_v0 = vmov 0.0|0.0   ;;  %vm4331_vm0 = vmmov 0   ;;  %v4332_v1 = vmov 0.0   ;;  %vm133_vm1 = vcmask 1043456  }
  0x4a   :  { %3869 = vmatprep.subr.bf16.mxu1 %v4330_v0  ;;  %3602 = vmatprep.mubr.msk.f32.mxu1 %vm4331_vm0, %v4332_v1  ;;  %vm126_vm2 = vcmask 31744   ;;  %v104_v2 = vld [vmem:[%s5171_s4] sm:$0xff]  ;;  %v105_v3 = vld [vmem:[%s5171_s4 + $0x8] sm:$0xff]  ;;  %v118_v4 = vld [vmem:[#allocation8] sm:$0xf]  ;;  %vm97_vm3 = vcmask 254976  }
  0x4b   :  { %v4471_v5 = vpack.c.bf16 %v105_v3, %v104_v2  ;;  %3589 = vmatprep.subr.msk.mxu0 %vm133_vm1, %v118_v4  ;;  %v116_v6 = vld [vmem:[%s5167_s0] sm:$0xff]  ;;  %v117_v7 = vld [vmem:[%s5167_s0 + $0x8] sm:$0xff]  ;;  %v106_v8 = vld [vmem:[%s5171_s4 + $0x10] sm:$0xff]  ;;  %vm225_vm4 = vcmask 261120   ;;  %vm455_vm5 = vcmask 1041409   ;;  %vm3207_vm6 = vcmask 1040384  }
  0x4c   :  { %3590 = vmatpush3.msk.msra.mxu0 %vm133_vm1, %v118_v4  ;;  %3591 = vmatprep.mubr.msk.f32.mxu0 %vm126_vm2, %v116_v6  ;;  %v107_v9 = vld [vmem:[%s5171_s4 + $0x18] sm:$0xff]  ;;  %v95_v10 = vld [vmem:[#allocation4] sm:$0x3]  ;;  %v100_v11 = vld [vmem:[#allocation6] sm:$0x3]  ;;  %vm3210_vm7 = vcmask 1041408  }
  0x4d   :  { %3871 = vmatpush3.bf16.msra.mxu1 %v4471_v5  ;;  %3592 = vmatmul.mubr.msk.f32.vlgmr.msra.gmra.mrb[0].mxu0 %vm126_vm2, %v117_v7  ;;  %v4490_v12 = vpack.c.bf16 %v107_v9, %v106_v8  ;;  %98 = vst.msk [vmem:[#allocation2] sm:$0x3] %vm97_vm3, %v95_v10  ;;  %102 = vst.msk [vmem:[#allocation3] sm:$0x3] %vm97_vm3, %v100_v11  ;;  %v3332_v18 = vld [vmem:[%s5172_s5] ss:$0 sm:$0xff] }
  0x4e   :  { %3872 = vmatprep.subr.bf16.mxu1 %v4330_v0  ;;  %3875 = vmatprep.subr.bf16.mxu0 %v4330_v0  ;;  %s4333_s5 = smov 64   ;;  %v112_v58 = vld [vmem:[#allocation9] sm:$0xff]  ;;  %v113_v59 = vld [vmem:[#allocation9 + $0x8] sm:$0xff]  ;;  %v114_v60 = vld [vmem:[#allocation9 + $0x10] sm:$0xff]  ;;  %vm3213_vm8 = vcmask 1042432   ;;  %vm3218_vm9 = vcmask 1044480  }
  0x4f   :  { %3613 = vmatprep.mubr.msk.f32.mxu0 %vm4331_vm0, %v4332_v1  ;;  %v4534_v62 = vpack.c.bf16 %v113_v59, %v112_v58  ;;  %v115_v63 = vld [vmem:[#allocation9 + $0x18] sm:$0xff]  ;;  %v96_v2 = vld [vmem:[#allocation4 + $0x2] sm:$0x3]  ;;  %v108_v3 = vld [vmem:[%s5173_s6] sm:$0xff]  ;;  %vm3221_vm10 = vcmask 1045504   ;;  %vm3224_vm11 = vcmask 1046528  }
  0x50   :  { %99 = vst.msk [vmem:[#allocation2 + $0x2] sm:$0x3] %vm97_vm3, %v96_v2  ;;  %v109_v6 = vld [vmem:[%s5173_s6 + $0x8] sm:$0xff]  ;;  %v110_v7 = vld [vmem:[%s5173_s6 + $0x10] sm:$0xff]  ;;  %v111_v8 = vld [vmem:[%s5173_s6 + $0x18] sm:$0xff]  ;;  %v4550_v9 = vpack.c.bf16 %v115_v63, %v114_v60  ;;  %vm2933_vm12 = vcmask 261127  }
  0x51   :  { %3874 = vmatpush3.bf16.msra.mxu1 %v4490_v12  ;;  %3877 = vmatpush3.bf16.msra.mxu0 %v4534_v62  ;;  %v4552_v10 = vpack.c.bf16 %v109_v6, %v108_v3  ;;  %vm2935_vm13 = vcmask 253952  }
  0x52   :  { %3881 = vmatprep.subr.bf16.mxu1 %v4330_v0  ;;  %3878 = vmatprep.subr.bf16.mxu0 %v4330_v0 }
  0x54   :  { %v219_v13 = vld [vmem:[#allocation2] sm:$0x3]  ;;  %v220_v14 = vld [vmem:[#allocation3] sm:$0x3] }
  0x55   :  { %3603 = vmatmul.mubr.msk.f32.vlgmr.msra.gmra.mrb[0].mxu1 %vm225_vm4, %v219_v13  ;;  %v322_v15 = vrot.slane %v220_v14, 1  ;;  %3880 = vmatpush3.bf16.msra.mxu0 %v4550_v9 }
  0x56   :  { %3624 = vmatprep.mubr.msk.f32.mxu1 %vm4331_vm0, %v4332_v1  ;;  %3883 = vmatpush3.bf16.msra.mxu1 %v4552_v10 }
  0x57   :  { %325 = vrot.lane.b32.xlu1 %v322_v15, %s4324_s29  ;;  %3884 = vmatprep.subr.bf16.mxu1 %v4330_v0 }
  0x58   :  { %3887 = vmatprep.subr.bf16.mxu0 %v4330_v0 }
  0x5b   :  { %323 = vrot.lane.b32.xlu1 %v220_v14, %s4324_s29  ;;  %v4556_v14 = vpack.c.bf16 %v111_v8, %v110_v7 }
  0x5d   :  { %3886 = vmatpush3.bf16.msra.mxu1 %v4556_v14 }
  0x5e   :  { %3893 = vmatprep.subr.bf16.mxu1 %v4330_v0 }
  0xc9   :  { %v326_v42 = vpop.permute.xlu1 %325 }
  0xcd   :  { %v324_v44 = vpop.permute.xlu1 %323 }
 0x120   :  { %v3593_v16 = vpop.f32.mrb[0].mxu0 }
 0x121   :  { %v203_v17 = vpop.f32.mrb[1].mxu0  ;;  %v4510_v20 = vadd.f32 %v3593_v16, %v3332_v18 }
 0x122   :  { %v4508_v19 = vadd.f32 %v3332_v18, %v203_v17  ;;  %v222_v17 = vld [vmem:[#allocation2 + $0x2] sm:$0x3] }
 0x123   :  { %3614 = vmatmul.mubr.msk.f32.vlgmr.msra.gmra.mrb[2].mxu0 %vm225_vm4, %v222_v17 }
 0x124   :  { %3889 = vmatpush3.bf16.msra.mxu0 %v4471_v5  ;;  %3635 = vmatprep.mubr.msk.f32.mxu0 %vm4331_vm0, %v4332_v1 }
 0x125   :  { %3890 = vmatprep.subr.bf16.mxu0 %v4330_v0 }
 0x128   :  { %v295_v21 = vpop.f32.mrb[0].mxu1  ;;  %3892 = vmatpush3.bf16.msra.mxu0 %v4490_v12 }
 0x129   :  { %v300_v22 = vrot.slane %v295_v21, 1  ;;  %v303_v23 = vadd.f32 %v295_v21, %v4508_v19  ;;  %v3604_v24 = vpop.f32.mrb[1].mxu1  ;;  %3899 = vmatprep.subr.bf16.mxu0 %v4330_v0 }
 0x12b   :  { %v304_v25 = vadd.f32 %v300_v22, %v4510_v20  ;;  %v3338_v26 = vmul.f32 -1.442695, %v303_v23 }
 0x12d   :  { %4035 = vpow2.f32 %v3338_v26  ;;  %v3339_v27 = vmul.f32 -1.442695, %v304_v25 }
 0x12f   :  { %4037 = vpow2.f32 %v3339_v27 }
 0x137   :  { %v4036_v28 = vpop.eup %4035 }
 0x138   :  { %v311_v29 = vadd.f32 1.0, %v4036_v28 }
 0x139   :  { %v4038_v30 = vpop.eup %4037 }
 0x13a   :  { %v312_v31 = vadd.f32 1.0, %v4038_v30  ;;  %4039 = vrcp.f32 %v311_v29  ;;  %v101_v29 = vld [vmem:[#allocation6 + $0x2] sm:$0x3]  ;;  %v4594_v30 = vld [vmem:[%s5175_s8] ss:$0 sm:$0xff] }
 0x13b   :  { %103 = vst.msk [vmem:[#allocation3 + $0x2] sm:$0x3] %vm97_vm3, %v101_v29 }
 0x13c   :  { %4041 = vrcp.f32 %v312_v31 }
 0x142   :  { %v224_v59 = vld [vmem:[#allocation3 + $0x2] sm:$0x3] }
 0x144   :  { %v4514_v32 = vpop.eup %4039 }
 0x145   :  { %v317_v36 = vmul.f32 2.0, %v4514_v32  ;;  %v329_v47 = vmul.f32 %v4514_v32, %v324_v44 }
 0x146   :  { %v4516_v33 = vpop.eup %4041 }
 0x147   :  { %v318_v34 = vmul.f32 2.0, %v4516_v33  ;;  %v3340_v37 = vadd.f32 -1.0, %v317_v36  ;;  %v330_v43 = vmul.f32 %v4516_v33, %v326_v42 }
 0x149   :  { %v3341_v35 = vadd.f32 -1.0, %v318_v34 }
 0x14b   :  { %335 = vrot.lane.b32.xlu0 %v3341_v35, %s4333_s5 }
 0x14f   :  { %333 = vrot.lane.b32.xlu0 %v3340_v37, %s4333_s5 }
 0x1bd   :  { %v336_v38 = vpop.permute.xlu0 %335 }
 0x1be   :  { %v340_v39 = vmul.f32 %v4516_v33, %v336_v38 }
 0x1c0   :  { %345 = vrot.lane.b32.xlu0 %v340_v39, %s4324_s29 }
 0x1c1   :  { %v334_v40 = vpop.permute.xlu0 %333 }
 0x1c2   :  { %v339_v41 = vmul.f32 %v4514_v32, %v334_v40 }
 0x1c4   :  { %343 = vrot.lane.b32.xlu1 %v339_v41, %s4324_s29 }
 0x1f6   :  { %v448_v26 = vpop.f32.mrb[2].mxu0 }
 0x1f7   :  { %v3615_v27 = vpop.f32.mrb[3].mxu0 }
 0x232   :  { %v346_v45 = vpop.permute.xlu0 %345 }
 0x233   :  { %v4527_v46 = vadd.f32 %v346_v45, %v330_v43 }
 0x235   :  { %v3343_v48 = vmul.f32 -2.0, %v4527_v46 }
 0x236   :  { %v344_v49 = vpop.permute.xlu1 %343 }
 0x237   :  { %v357_v50 = vmul.f32 1.442695, %v3343_v48  ;;  %v4531_v51 = vadd.f32 %v344_v49, %v329_v47 }
 0x239   :  { %4043 = vpow2.f32 %v357_v50  ;;  %v3342_v52 = vmul.f32 -2.0, %v4531_v51  ;;  %v663_v8 = vrot.slane %v4531_v51, 7 }
 0x23b   :  { %v355_v53 = vmul.f32 1.442695, %v3342_v52 }
 0x23d   :  { %4045 = vpow2.f32 %v355_v53 }
 0x243   :  { %v4044_v54 = vpop.eup %4043 }
 0x244   :  { %v360_v55 = vadd.f32 1.0, %v4044_v54 }
 0x246   :  { %4047 = vrcp.f32 %v360_v55 }
 0x247   :  { %v4046_v56 = vpop.eup %4045 }
 0x248   :  { %v359_v57 = vadd.f32 1.0, %v4046_v56 }
 0x24a   :  { %4049 = vrcp.f32 %v359_v57 }
 0x250   :  { %v4048_v61 = vpop.eup %4047 }
 0x251   :  { %v366_v4 = vmul.f32 2.0, %v4048_v61 }
 0x253   :  { %v3345_v11 = vadd.f32 -1.0, %v366_v4 }
 0x254   :  { %v4050_v13 = vpop.eup %4049 }
 0x255   :  { %373 = vrot.lane.b32.xlu0 %v3345_v11, %s4333_s5  ;;  %v365_v15 = vmul.f32 2.0, %v4050_v13 }
 0x257   :  { %v3344_v16 = vadd.f32 -1.0, %v365_v15 }
 0x259   :  { %371 = vrot.lane.b32.xlu1 %v3344_v16, %s4333_s5  ;;  %v664_v16 = vrot.slane %v4527_v46, 7 }
 0x2c7   :  { %v374_v18 = vpop.permute.xlu0 %373 }
 0x2c8   :  { %v378_v21 = vmul.f32 %v4516_v33, %v374_v18 }
 0x2ca   :  { %v454_v23 = vrot.slane %v378_v21, 7 }
 0x2cb   :  { %v372_v22 = vpop.permute.xlu1 %371 }
 0x2cc   :  { %v377_v24 = vmul.f32 %v4514_v32, %v372_v22 }
 0x2ce   :  { %v456_v25 = vsel %vm455_vm5, %v454_v23, %v377_v24 }
 0x2cf   :  { %457 = vrot.lane.b32.xlu0 %v456_v25, %s4324_s29 }
 0x341   :  { %v458_v28 = vpop.permute.xlu0 %457 }
 0x342   :  { %3625 = vmatmul.mubr.msk.f32.vlgmr.msra.gmra.mrb[2].mxu1 %vm225_vm4, %v458_v28  ;;  %3636 = vmatmul.mubr.msk.f32.vlgmr.msra.gmra.mrb[4].mxu0 %vm225_vm4, %v458_v28 }
 0x343   :  { %3895 = vmatpush3.bf16.msra.mxu1 %v4534_v62  ;;  %3901 = vmatpush3.bf16.msra.mxu0 %v4552_v10 }
 0x344   :  { %3896 = vmatprep.subr.bf16.mxu1 %v4330_v0  ;;  %3646 = vmatprep.mubr.msk.f32.mxu1 %vm4331_vm0, %v4332_v1 }
 0x345   :  { %3902 = vmatprep.subr.bf16.mxu0 %v4330_v0  ;;  %3657 = vmatprep.mubr.msk.f32.mxu0 %vm4331_vm0, %v4332_v1 }
 0x347   :  { %3898 = vmatpush3.bf16.msra.mxu1 %v4550_v9  ;;  %3904 = vmatpush3.bf16.msra.mxu0 %v4556_v14 }
 0x348   :  { %3905 = vmatprep.subr.bf16.mxu1 %v4330_v0  ;;  %3911 = vmatprep.subr.bf16.mxu0 %v4330_v0 }
 0x415   :  { %v527_v31 = vpop.f32.mrb[2].mxu1  ;;  %v635_v32 = vpop.f32.mrb[4].mxu0 }
 0x416   :  { %v528_v33 = vadd.f32 %v527_v31, %v448_v26  ;;  %v640_v34 = vrot.slane %v635_v32, 7  ;;  %v644_v35 = vadd.f32 %v635_v32, %v4510_v20  ;;  %v3626_v36 = vpop.f32.mrb[3].mxu1  ;;  %v3637_v37 = vpop.f32.mrb[5].mxu0 }
 0x418   :  { %v531_v38 = vadd.f32 %v4594_v30, %v528_v33  ;;  %v643_v39 = vadd.f32 %v640_v34, %v4508_v19  ;;  %v3354_v40 = vmul.f32 -1.442695, %v644_v35 }
 0x41a   :  { %v3348_v41 = vmul.f32 -1.442695, %v531_v38  ;;  %v3353_v42 = vmul.f32 -1.442695, %v643_v39  ;;  %4051 = vpow2.f32 %v3354_v40 }
 0x41c   :  { %4053 = vpow2.f32 %v3348_v41 }
 0x41d   :  { %4055 = vpow2.f32 %v3353_v42 }
 0x424   :  { %v4052_v43 = vpop.eup %4051 }
 0x425   :  { %v652_v44 = vadd.f32 1.0, %v4052_v43 }
 0x426   :  { %v4054_v45 = vpop.eup %4053 }
 0x427   :  { %v4056_v47 = vpop.eup %4055  ;;  %v535_v48 = vadd.f32 1.0, %v4054_v45  ;;  %4057 = vrcp.f32 %v652_v44 }
 0x428   :  { %v651_v49 = vadd.f32 1.0, %v4056_v47 }
 0x429   :  { %4059 = vrcp.f32 %v535_v48 }
 0x42a   :  { %4061 = vrcp.f32 %v651_v49 }
 0x431   :  { %v4599_v50 = vpop.eup %4057 }
 0x432   :  { %v658_v57 = vmul.f32 2.0, %v4599_v50  ;;  %v668_v23 = vmul.f32 %v4599_v50, %v664_v16 }
 0x433   :  { %v4601_v52 = vpop.eup %4059 }
 0x434   :  { %v4603_v53 = vpop.eup %4061  ;;  %v538_v54 = vmul.f32 2.0, %v4601_v52  ;;  %v3356_v60 = vadd.f32 -1.0, %v658_v57 }
 0x435   :  { %v657_v55 = vmul.f32 2.0, %v4603_v53  ;;  %v667_v13 = vmul.f32 %v4603_v53, %v663_v8 }
 0x436   :  { %v3349_v56 = vadd.f32 -1.0, %v538_v54 }
 0x437   :  { %v3355_v58 = vadd.f32 -1.0, %v657_v55 }
 0x438   :  { %546 = vrot.lane.b32.xlu1 %v3349_v56, %s4333_s5 }
 0x439   :  { %671 = vrot.lane.b32.xlu0 %v3355_v58, %s4333_s5 }
 0x43c   :  { %673 = vrot.lane.b32.xlu1 %v3356_v60, %s4333_s5 }
 0x43d   :  { %541 = vrot.lane.b32.xlu0 %v224_v59, %s4324_s29 }
 0x4aa   :  { %v547_v61 = vpop.permute.xlu1 %546 }
 0x4ab   :  { %v672_v63 = vpop.permute.xlu0 %671  ;;  %v549_v2 = vmul.f32 %v4601_v52, %v547_v61 }
 0x4ac   :  { %v677_v3 = vmul.f32 %v4603_v53, %v672_v63 }
 0x4ad   :  { %551 = vrot.lane.b32.xlu1 %v549_v2, %s4324_s29 }
 0x4ae   :  { %681 = vrot.lane.b32.xlu0 %v677_v3, %s4324_s29  ;;  %v674_v4 = vpop.permute.xlu1 %673 }
 0x4af   :  { %v678_v6 = vmul.f32 %v4599_v50, %v674_v4  ;;  %v542_v7 = vpop.permute.xlu0 %541 }
 0x4b0   :  { %v544_v11 = vmul.f32 %v4601_v52, %v542_v7 }
 0x4b1   :  { %683 = vrot.lane.b32.xlu1 %v678_v6, %s4324_s29 }
 0x51f   :  { %v552_v15 = vpop.permute.xlu1 %551 }
 0x520   :  { %v682_v17 = vpop.permute.xlu0 %681  ;;  %v4622_v18 = vadd.f32 %v552_v15, %v544_v11 }
 0x521   :  { %v4624_v21 = vadd.f32 %v682_v17, %v667_v13 }
 0x522   :  { %v3350_v22 = vmul.f32 -2.0, %v4622_v18 }
 0x523   :  { %v3357_v24 = vmul.f32 -2.0, %v4624_v21  ;;  %v684_v25 = vpop.permute.xlu1 %683 }
 0x524   :  { %v557_v51 = vmul.f32 1.442695, %v3350_v22  ;;  %v4629_v26 = vadd.f32 %v684_v25, %v668_v23 }
 0x525   :  { %v693_v27 = vmul.f32 1.442695, %v3357_v24 }
 0x526   :  { %4063 = vpow2.f32 %v557_v51  ;;  %v3358_v28 = vmul.f32 -2.0, %v4629_v26 }
 0x527   :  { %4065 = vpow2.f32 %v693_v27 }
 0x528   :  { %v695_v46 = vmul.f32 1.442695, %v3358_v28 }
 0x52a   :  { %4067 = vpow2.f32 %v695_v46 }
 0x530   :  { %v4064_v29 = vpop.eup %4063 }
 0x531   :  { %v4066_v31 = vpop.eup %4065  ;;  %v559_v32 = vadd.f32 1.0, %v4064_v29 }
 0x532   :  { %v697_v33 = vadd.f32 1.0, %v4066_v31 }
 0x533   :  { %4069 = vrcp.f32 %v559_v32 }
 0x534   :  { %v4068_v34 = vpop.eup %4067  ;;  %4071 = vrcp.f32 %v697_v33 }
 0x535   :  { %v698_v35 = vadd.f32 1.0, %v4068_v34 }
 0x537   :  { %4073 = vrcp.f32 %v698_v35 }
 0x53d   :  { %v4070_v36 = vpop.eup %4069 }
 0x53e   :  { %v4072_v37 = vpop.eup %4071  ;;  %v562_v38 = vmul.f32 2.0, %v4070_v36 }
 0x53f   :  { %v703_v39 = vmul.f32 2.0, %v4072_v37 }
 0x540   :  { %v3351_v40 = vadd.f32 -1.0, %v562_v38 }
 0x541   :  { %v4074_v41 = vpop.eup %4073  ;;  %v3359_v42 = vadd.f32 -1.0, %v703_v39 }
 0x542   :  { %565 = vrot.lane.b32.xlu0 %v3351_v40, %s4333_s5  ;;  %v704_v43 = vmul.f32 2.0, %v4074_v41 }
 0x543   :  { %709 = vrot.lane.b32.xlu1 %v3359_v42, %s4333_s5  ;;  %v999_v42 = vrot.slane %v4624_v21, 7 }
 0x544   :  { %v3360_v44 = vadd.f32 -1.0, %v704_v43 }
 0x546   :  { %711 = vrot.lane.b32.xlu0 %v3360_v44, %s4333_s5  ;;  %v1000_v44 = vrot.slane %v4629_v26, 7 }
 0x5b4   :  { %v566_v45 = vpop.permute.xlu0 %565 }
 0x5b5   :  { %v4636_v47 = vmul.f32 %v4601_v52, %v566_v45  ;;  %v710_v48 = vpop.permute.xlu1 %709 }
 0x5b6   :  { %v715_v49 = vmul.f32 %v4603_v53, %v710_v48 }
 0x5b7   :  { %718 = vrot.lane.b32.xlu1 %v4636_v47, %s4324_s29 }
 0x5b8   :  { %v712_v54 = vpop.permute.xlu0 %711  ;;  %v794_v55 = vrot.slane %v715_v49, 1 }
 0x5b9   :  { %v716_v56 = vmul.f32 %v4599_v50, %v712_v54 }
 0x5bb   :  { %v795_v57 = vsel %vm455_vm5, %v716_v56, %v794_v55 }
 0x5bc   :  { %796 = vrot.lane.b32.xlu0 %v795_v57, %s4324_s29 }
 0x629   :  { %v719_v58 = vpop.permute.xlu1 %718 }
 0x62a   :  { %3647 = vmatmul.mubr.msk.f32.vlgmr.msra.gmra.mrb[4].mxu1 %vm225_vm4, %v719_v58 }
 0x62b   :  { %3907 = vmatpush3.bf16.msra.mxu1 %v4471_v5  ;;  %3668 = vmatprep.mubr.msk.f32.mxu1 %vm4331_vm0, %v4332_v1 }
 0x62c   :  { %3908 = vmatprep.subr.bf16.mxu1 %v4330_v0 }
 0x62e   :  { %v797_v52 = vpop.permute.xlu0 %796 }
 0x62f   :  { %3910 = vmatpush3.bf16.msra.mxu1 %v4490_v12  ;;  %3658 = vmatmul.mubr.msk.f32.vlgmr.msra.gmra.mrb[6].mxu0 %vm225_vm4, %v797_v52 }
 0x630   :  { %3913 = vmatpush3.bf16.msra.mxu0 %v4534_v62  ;;  %3679 = vmatprep.mubr.msk.f32.mxu0 %vm4331_vm0, %v4332_v1 }
 0x631   :  { %3914 = vmatprep.subr.bf16.mxu0 %v4330_v0  ;;  %3917 = vmatprep.subr.bf16.mxu1 %v4330_v0 }
 0x632   :  { %3669 = vmatmul.mubr.msk.f32.vlgmr.msra.gmra.mrb[6].mxu1 %vm225_vm4, %v797_v52 }
 0x633   :  { %3919 = vmatpush3.bf16.msra.mxu1 %v4552_v10  ;;  %3690 = vmatprep.mubr.msk.f32.mxu1 %vm4331_vm0, %v4332_v1 }
 0x634   :  { %3916 = vmatpush3.bf16.msra.mxu0 %v4550_v9  ;;  %3920 = vmatprep.subr.bf16.mxu1 %v4330_v0 }
 0x635   :  { %3923 = vmatprep.subr.bf16.mxu0 %v4330_v0 }
 0x637   :  { %3922 = vmatpush3.bf16.msra.mxu1 %v4556_v14 }
 0x638   :  { %3929 = vmatprep.subr.bf16.mxu1 %v4330_v0 }
 0x6fd   :  { %v788_v50 = vpop.f32.mrb[4].mxu1 }
 0x6fe   :  { %v3648_v53 = vpop.f32.mrb[5].mxu1 }
 0x702   :  { %v866_v59 = vpop.f32.mrb[6].mxu0 }
 0x703   :  { %v867_v60 = vadd.f32 %v866_v59, %v788_v50  ;;  %v3659_v61 = vpop.f32.mrb[7].mxu0 }
 0x705   :  { %v870_v63 = vadd.f32 %v4594_v30, %v867_v60  ;;  %v970_v2 = vpop.f32.mrb[6].mxu1 }
 0x706   :  { %v975_v3 = vrot.slane %v970_v2, 6  ;;  %v976_v4 = vrot.slane %v970_v2, 7  ;;  %v3670_v6 = vpop.f32.mrb[7].mxu1 }
 0x707   :  { %v3363_v7 = vmul.f32 -1.442695, %v870_v63 }
 0x708   :  { %v979_v8 = vadd.f32 %v975_v3, %v4508_v19  ;;  %v980_v11 = vadd.f32 %v976_v4, %v4510_v20 }
 0x709   :  { %4075 = vpow2.f32 %v3363_v7 }
 0x70a   :  { %v3368_v13 = vmul.f32 -1.442695, %v979_v8  ;;  %v3369_v15 = vmul.f32 -1.442695, %v980_v11 }
 0x70c   :  { %4077 = vpow2.f32 %v3368_v13 }
 0x70d   :  { %4079 = vpow2.f32 %v3369_v15 }
 0x713   :  { %v4076_v16 = vpop.eup %4075 }
 0x714   :  { %v874_v17 = vadd.f32 1.0, %v4076_v16 }
 0x716   :  { %v4078_v22 = vpop.eup %4077  ;;  %4081 = vrcp.f32 %v874_v17  ;;  %v4334_v17 = vmov 1966171168  }
 0x717   :  { %v4080_v23 = vpop.eup %4079  ;;  %v987_v24 = vadd.f32 1.0, %v4078_v22  ;;  %v2960_v22 = vunpack.c.l.s4 %v4334_v17 }
 0x718   :  { %v988_v25 = vadd.f32 1.0, %v4080_v23  ;;  %v2962_v23 = vlaneseq }
 0x719   :  { %4083 = vrcp.f32 %v987_v24  ;;  %v2961_v24 = vunpack.c.0.s8 %v2960_v22 }
 0x71a   :  { %4085 = vrcp.f32 %v988_v25  ;;  %v2963_v25 = vshrl.u32 %v2962_v23, 7 }
 0x720   :  { %v4668_v51 = vpop.eup %4081 }
 0x721   :  { %v877_v27 = vmul.f32 2.0, %v4668_v51  ;;  %v879_v41 = vmul.f32 %v4668_v51, %v4622_v18 }
 0x723   :  { %v4671_v28 = vpop.eup %4083  ;;  %v3364_v46 = vadd.f32 -1.0, %v877_v27  ;;  %v4704_v27 = vsub.s32 %v2961_v24, %v2963_v25 }
 0x724   :  { %v4673_v29 = vpop.eup %4085  ;;  %v993_v31 = vmul.f32 2.0, %v4671_v28  ;;  %v1003_v48 = vmul.f32 %v4671_v28, %v999_v42 }
 0x725   :  { %881 = vrot.lane.b32.xlu1 %v3364_v46, %s4333_s5  ;;  %v994_v32 = vmul.f32 2.0, %v4673_v29  ;;  %v1004_v55 = vmul.f32 %v4673_v29, %v1000_v44 }
 0x726   :  { %v3370_v33 = vadd.f32 -1.0, %v993_v31  ;;  %v2965_v31 = vrot.slane %v4636_v47, %v4704_v27 }
 0x727   :  { %v3371_v34 = vadd.f32 -1.0, %v994_v32 }
 0x728   :  { %1007 = vrot.lane.b32.xlu0 %v3370_v33, %s4333_s5  ;;  %v4709_v33 = vsub.s32 0, %v2963_v25  ;;  %v2973_v47 = vrot.slane %v2965_v31, %v4704_v27 }
 0x729   :  { %1009 = vrot.lane.b32.xlu1 %v3371_v34, %s4333_s5 }
 0x797   :  { %v882_v35 = vpop.permute.xlu1 %881 }
 0x798   :  { %v884_v36 = vmul.f32 %v4668_v51, %v882_v35 }
 0x79a   :  { %v1008_v37 = vpop.permute.xlu0 %1007  ;;  %886 = vrot.lane.b32.xlu0 %v884_v36, %s4324_s29 }
 0x79b   :  { %v1013_v38 = vmul.f32 %v4671_v28, %v1008_v37  ;;  %v1010_v39 = vpop.permute.xlu1 %1009 }
 0x79c   :  { %v1014_v40 = vmul.f32 %v4673_v29, %v1010_v39 }
 0x79d   :  { %1017 = vrot.lane.b32.xlu1 %v1013_v38, %s4324_s29  ;;  %v2966_v38 = vcombine.high %v2965_v31, %v2965_v31 }
 0x79e   :  { %1019 = vrot.lane.b32.xlu0 %v1014_v40, %s4324_s29 }
 0x80c   :  { %v887_v43 = vpop.permute.xlu0 %886 }
 0x80d   :  { %v4690_v45 = vadd.f32 %v887_v43, %v879_v41 }
 0x80f   :  { %v3365_v49 = vmul.f32 -2.0, %v4690_v45  ;;  %v1018_v54 = vpop.permute.xlu1 %1017 }
 0x810   :  { %v4695_v56 = vadd.f32 %v1018_v54, %v1003_v48  ;;  %v1020_v57 = vpop.permute.xlu0 %1019  ;;  %v2980_v48 = vrot.slane %v2966_v38, %v4704_v27 }
 0x811   :  { %v892_v58 = vmul.f32 1.442695, %v3365_v49  ;;  %v4697_v52 = vadd.f32 %v1020_v57, %v1004_v55 }
 0x812   :  { %v3372_v18 = vmul.f32 -2.0, %v4695_v56 }
 0x813   :  { %4087 = vpow2.f32 %v892_v58  ;;  %v3373_v21 = vmul.f32 -2.0, %v4697_v52 }
 0x814   :  { %v1029_v26 = vmul.f32 1.442695, %v3372_v18 }
 0x815   :  { %v1031_v50 = vmul.f32 1.442695, %v3373_v21 }
 0x816   :  { %4089 = vpow2.f32 %v1029_v26 }
 0x817   :  { %4091 = vpow2.f32 %v1031_v50 }
 0x81d   :  { %v4088_v53 = vpop.eup %4087 }
 0x81e   :  { %v894_v59 = vadd.f32 1.0, %v4088_v53 }
 0x820   :  { %v4090_v60 = vpop.eup %4089  ;;  %4093 = vrcp.f32 %v894_v59 }
 0x821   :  { %v4092_v61 = vpop.eup %4091  ;;  %v1033_v63 = vadd.f32 1.0, %v4090_v60 }
 0x822   :  { %v1034_v2 = vadd.f32 1.0, %v4092_v61 }
 0x823   :  { %4095 = vrcp.f32 %v1033_v63 }
 0x824   :  { %4097 = vrcp.f32 %v1034_v2 }
 0x82a   :  { %v4094_v3 = vpop.eup %4093 }
 0x82b   :  { %v897_v4 = vmul.f32 2.0, %v4094_v3 }
 0x82d   :  { %v4096_v6 = vpop.eup %4095  ;;  %v3366_v7 = vadd.f32 -1.0, %v897_v4 }
 0x82e   :  { %v4098_v8 = vpop.eup %4097  ;;  %v1039_v11 = vmul.f32 2.0, %v4096_v6 }
 0x82f   :  { %900 = vrot.lane.b32.xlu1 %v3366_v7, %s4333_s5  ;;  %v1040_v13 = vmul.f32 2.0, %v4098_v8 }
 0x830   :  { %v3374_v15 = vadd.f32 -1.0, %v1039_v11 }
 0x831   :  { %v3375_v16 = vadd.f32 -1.0, %v1040_v13 }
 0x832   :  { %1045 = vrot.lane.b32.xlu0 %v3374_v15, %s4333_s5 }
 0x833   :  { %1047 = vrot.lane.b32.xlu1 %v3375_v16, %s4333_s5 }
 0x8a1   :  { %v901_v46 = vpop.permute.xlu1 %900 }
 0x8a2   :  { %v903_v32 = vmul.f32 %v4668_v51, %v901_v46 }
 0x8a4   :  { %v2989_v34 = vrot.slane %v903_v32, %v4704_v27  ;;  %v1046_v35 = vpop.permute.xlu0 %1045  ;;  %1054 = vrot.lane.b32.xlu0 %v903_v32, %s4324_s29 }
 0x8a5   :  { %v1051_v36 = vmul.f32 %v4671_v28, %v1046_v35  ;;  %v1048_v37 = vpop.permute.xlu1 %1047 }
 0x8a6   :  { %v2990_v39 = vcombine.high %v2989_v34, %v2989_v34  ;;  %v2997_v40 = vrot.slane %v2989_v34, %v4704_v27  ;;  %v1052_v41 = vmul.f32 %v4673_v29, %v1048_v37 }
 0x8a7   :  { %v1130_v43 = vrot.slane %v1051_v36, 2 }
 0x8a8   :  { %v3004_v51 = vrot.slane %v2990_v39, %v4704_v27  ;;  %v3140_v42 = vrot.slane %v2997_v40, %v4709_v33  ;;  %v1131_v44 = vrot.slane %v1052_v41, 1 }
 0x8aa   :  { %v3144_v28 = vrot.slane %v3004_v51, %v4709_v33  ;;  %v4721_v49 = vsel %vm3207_vm6, %v2973_v47, %v3140_v42  ;;  %v1132_v54 = vsel %vm455_vm5, %v1131_v44, %v1130_v43  ;;  %v1336_v47 = vrot.slane %v4695_v56, 7 }
 0x8ab   :  { %1133 = vrot.lane.b32.xlu1 %v1132_v54, %s4324_s29  ;;  %v1337_v44 = vrot.slane %v4697_v52, 7 }
 0x8ac   :  { %v4725_v29 = vsel %vm3207_vm6, %v2980_v48, %v3144_v28 }
 0x916   :  { %v1055_v55 = vpop.permute.xlu0 %1054 }
 0x917   :  { %3680 = vmatmul.mubr.msk.f32.vlgmr.msra.gmra.mrb[8].mxu0 %vm225_vm4, %v1055_v55 }
 0x918   :  { %3925 = vmatpush3.bf16.msra.mxu0 %v4471_v5  ;;  %3701 = vmatprep.mubr.msk.f32.mxu0 %vm4331_vm0, %v4332_v1 }
 0x919   :  { %3926 = vmatprep.subr.bf16.mxu0 %v4330_v0 }
 0x91c   :  { %3928 = vmatpush3.bf16.msra.mxu0 %v4490_v12 }
 0x91d   :  { %v1134_v57 = vpop.permute.xlu1 %1133  ;;  %3935 = vmatprep.subr.bf16.mxu0 %v4330_v0 }
 0x91e   :  { %3691 = vmatmul.mubr.msk.f32.vlgmr.msra.gmra.mrb[8].mxu1 %vm225_vm4, %v1134_v57 }
 0x91f   :  { %3702 = vmatmul.mubr.msk.f32.vlgmr.msra.gmra.mrb[10].mxu0 %vm225_vm4, %v1134_v57  ;;  %3931 = vmatpush3.bf16.msra.mxu1 %v4534_v62 }
 0x920   :  { %3932 = vmatprep.subr.bf16.mxu1 %v4330_v0  ;;  %3712 = vmatprep.mubr.msk.f32.mxu1 %vm4331_vm0, %v4332_v1 }
 0x921   :  { %3937 = vmatpush3.bf16.msra.mxu0 %v4552_v10  ;;  %3723 = vmatprep.mubr.msk.f32.mxu0 %vm4331_vm0, %v4332_v1 }
 0x922   :  { %3938 = vmatprep.subr.bf16.mxu0 %v4330_v0 }
 0x923   :  { %3934 = vmatpush3.bf16.msra.mxu1 %v4550_v9 }
 0x924   :  { %3941 = vmatprep.subr.bf16.mxu1 %v4330_v0 }
 0x925   :  { %3940 = vmatpush3.bf16.msra.mxu0 %v4556_v14 }
 0x926   :  { %3947 = vmatprep.subr.bf16.mxu0 %v4330_v0 }
 0x9ea   :  { %v1124_v58 = vpop.f32.mrb[8].mxu0 }
 0x9eb   :  { %v3681_v18 = vpop.f32.mrb[9].mxu0 }
 0x9f1   :  { %v1203_v21 = vpop.f32.mrb[8].mxu1 }
 0x9f2   :  { %v1204_v26 = vadd.f32 %v1203_v21, %v1124_v58  ;;  %v1307_v50 = vpop.f32.mrb[10].mxu0  ;;  %v3692_v53 = vpop.f32.mrb[9].mxu1 }
 0x9f3   :  { %v1312_v59 = vrot.slane %v1307_v50, 5  ;;  %v1313_v60 = vrot.slane %v1307_v50, 6  ;;  %v3703_v61 = vpop.f32.mrb[11].mxu0 }
 0x9f4   :  { %v1207_v63 = vadd.f32 %v4594_v30, %v1204_v26 }
 0x9f5   :  { %v1316_v2 = vadd.f32 %v1312_v59, %v4508_v19  ;;  %v1317_v3 = vadd.f32 %v1313_v60, %v4510_v20 }
 0x9f6   :  { %v3378_v4 = vmul.f32 -1.442695, %v1207_v63 }
 0x9f7   :  { %v3383_v6 = vmul.f32 -1.442695, %v1316_v2  ;;  %v3384_v7 = vmul.f32 -1.442695, %v1317_v3 }
 0x9f8   :  { %4099 = vpow2.f32 %v3378_v4 }
 0x9f9   :  { %4101 = vpow2.f32 %v3383_v6 }
 0x9fa   :  { %4103 = vpow2.f32 %v3384_v7 }
 0xa02   :  { %v4100_v8 = vpop.eup %4099 }
 0xa03   :  { %v4102_v11 = vpop.eup %4101  ;;  %v1211_v13 = vadd.f32 1.0, %v4100_v8 }
 0xa04   :  { %v4104_v15 = vpop.eup %4103  ;;  %v1324_v16 = vadd.f32 1.0, %v4102_v11 }
 0xa05   :  { %4105 = vrcp.f32 %v1211_v13  ;;  %v1325_v17 = vadd.f32 1.0, %v4104_v15 }
 0xa06   :  { %4107 = vrcp.f32 %v1324_v16 }
 0xa07   :  { %4109 = vrcp.f32 %v1325_v17 }
 0xa0f   :  { %v4751_v22 = vpop.eup %4105 }
 0xa10   :  { %v4753_v23 = vpop.eup %4107  ;;  %v1214_v24 = vmul.f32 2.0, %v4751_v22  ;;  %v1216_v51 = vmul.f32 %v4751_v22, %v4690_v45 }
 0xa11   :  { %v4756_v25 = vpop.eup %4109  ;;  %v1330_v46 = vmul.f32 2.0, %v4753_v23  ;;  %v1340_v43 = vmul.f32 %v4753_v23, %v1336_v47 }
 0xa12   :  { %v3379_v31 = vadd.f32 -1.0, %v1214_v24  ;;  %v1331_v32 = vmul.f32 2.0, %v4756_v25  ;;  %v1341_v57 = vmul.f32 %v4756_v25, %v1337_v44 }
 0xa13   :  { %v3385_v34 = vadd.f32 -1.0, %v1330_v46 }
 0xa14   :  { %1218 = vrot.lane.b32.xlu0 %v3379_v31, %s4333_s5  ;;  %v3386_v35 = vadd.f32 -1.0, %v1331_v32 }
 0xa15   :  { %1344 = vrot.lane.b32.xlu1 %v3385_v34, %s4333_s5 }
 0xa18   :  { %1346 = vrot.lane.b32.xlu0 %v3386_v35, %s4333_s5 }
 0xa86   :  { %v1219_v36 = vpop.permute.xlu0 %1218 }
 0xa87   :  { %v1345_v37 = vpop.permute.xlu1 %1344  ;;  %v1221_v38 = vmul.f32 %v4751_v22, %v1219_v36 }
 0xa88   :  { %v1350_v39 = vmul.f32 %v4753_v23, %v1345_v37 }
 0xa89   :  { %1223 = vrot.lane.b32.xlu1 %v1221_v38, %s4324_s29 }
 0xa8a   :  { %1354 = vrot.lane.b32.xlu0 %v1350_v39, %s4324_s29  ;;  %v1347_v40 = vpop.permute.xlu0 %1346 }
 0xa8b   :  { %v1351_v41 = vmul.f32 %v4756_v25, %v1347_v40 }
 0xa8d   :  { %1356 = vrot.lane.b32.xlu1 %v1351_v41, %s4324_s29 }
 0xafb   :  { %v1224_v42 = vpop.permute.xlu1 %1223 }
 0xafc   :  { %v4774_v48 = vadd.f32 %v1224_v42, %v1216_v51  ;;  %v1355_v28 = vpop.permute.xlu0 %1354 }
 0xafd   :  { %v4776_v54 = vadd.f32 %v1355_v28, %v1340_v43 }
 0xafe   :  { %v3380_v55 = vmul.f32 -2.0, %v4774_v48 }
 0xaff   :  { %v3387_v58 = vmul.f32 -2.0, %v4776_v54  ;;  %v1357_v56 = vpop.permute.xlu1 %1356 }
 0xb00   :  { %v1229_v18 = vmul.f32 1.442695, %v3380_v55  ;;  %v4781_v21 = vadd.f32 %v1357_v56, %v1341_v57 }
 0xb01   :  { %v1366_v45 = vmul.f32 1.442695, %v3387_v58 }
 0xb02   :  { %4111 = vpow2.f32 %v1229_v18  ;;  %v3388_v26 = vmul.f32 -2.0, %v4781_v21 }
 0xb03   :  { %4113 = vpow2.f32 %v1366_v45 }
 0xb04   :  { %v1368_v52 = vmul.f32 1.442695, %v3388_v26 }
 0xb06   :  { %4115 = vpow2.f32 %v1368_v52 }
 0xb0c   :  { %v4112_v50 = vpop.eup %4111 }
 0xb0d   :  { %v4114_v53 = vpop.eup %4113  ;;  %v1231_v59 = vadd.f32 1.0, %v4112_v50 }
 0xb0e   :  { %v1370_v60 = vadd.f32 1.0, %v4114_v53 }
 0xb0f   :  { %4117 = vrcp.f32 %v1231_v59 }
 0xb10   :  { %v4116_v61 = vpop.eup %4115  ;;  %4119 = vrcp.f32 %v1370_v60 }
 0xb11   :  { %v1371_v63 = vadd.f32 1.0, %v4116_v61 }
 0xb13   :  { %4121 = vrcp.f32 %v1371_v63 }
 0xb19   :  { %v4118_v2 = vpop.eup %4117 }
 0xb1a   :  { %v4120_v3 = vpop.eup %4119  ;;  %v1234_v4 = vmul.f32 2.0, %v4118_v2 }
 0xb1b   :  { %v1376_v6 = vmul.f32 2.0, %v4120_v3 }
 0xb1c   :  { %v3381_v7 = vadd.f32 -1.0, %v1234_v4 }
 0xb1d   :  { %v4122_v8 = vpop.eup %4121  ;;  %v3389_v11 = vadd.f32 -1.0, %v1376_v6 }
 0xb1e   :  { %1237 = vrot.lane.b32.xlu0 %v3381_v7, %s4333_s5  ;;  %v1377_v13 = vmul.f32 2.0, %v4122_v8 }
 0xb1f   :  { %1382 = vrot.lane.b32.xlu1 %v3389_v11, %s4333_s5 }
 0xb20   :  { %v3390_v15 = vadd.f32 -1.0, %v1377_v13 }
 0xb22   :  { %1384 = vrot.lane.b32.xlu0 %v3390_v15, %s4333_s5 }
 0xb90   :  { %v1238_v16 = vpop.permute.xlu0 %1237 }
 0xb91   :  { %v1383_v17 = vpop.permute.xlu1 %1382  ;;  %v1240_v24 = vmul.f32 %v4751_v22, %v1238_v16 }
 0xb92   :  { %v1388_v46 = vmul.f32 %v4753_v23, %v1383_v17 }
 0xb93   :  { %v3011_v31 = vrot.slane %v1240_v24, %v4704_v27  ;;  %1391 = vrot.lane.b32.xlu1 %v1240_v24, %s4324_s29 }
 0xb94   :  { %v1385_v32 = vpop.permute.xlu0 %1384  ;;  %v1467_v37 = vrot.slane %v1388_v46, 3 }
 0xb95   :  { %v3012_v34 = vcombine.high %v3011_v31, %v3011_v31  ;;  %v3019_v35 = vrot.slane %v3011_v31, %v4704_v27  ;;  %v1389_v36 = vmul.f32 %v4756_v25, %v1385_v32 }
 0xb97   :  { %v3026_v38 = vrot.slane %v3012_v34, %v4704_v27  ;;  %v3150_v39 = vrot.slane %v3019_v35, %v4709_v33  ;;  %v1468_v40 = vrot.slane %v1389_v36, 2  ;;  %v1673_v34 = vrot.slane %v4776_v54, 7 }
 0xb99   :  { %v3154_v22 = vrot.slane %v3026_v38, %v4709_v33  ;;  %v4797_v23 = vsel %vm3210_vm7, %v4721_v49, %v3150_v39  ;;  %v1469_v41 = vsel %vm455_vm5, %v1468_v40, %v1467_v37  ;;  %v1674_v38 = vrot.slane %v4781_v21, 7 }
 0xb9a   :  { %1470 = vrot.lane.b32.xlu0 %v1469_v41, %s4324_s29 }
 0xb9b   :  { %v4802_v47 = vsel %vm3210_vm7, %v4725_v29, %v3154_v22 }
 0xc05   :  { %v1392_v25 = vpop.permute.xlu1 %1391 }
 0xc06   :  { %3713 = vmatmul.mubr.msk.f32.vlgmr.msra.gmra.mrb[10].mxu1 %vm225_vm4, %v1392_v25 }
 0xc07   :  { %3943 = vmatpush3.bf16.msra.mxu1 %v4471_v5  ;;  %3734 = vmatprep.mubr.msk.f32.mxu1 %vm4331_vm0, %v4332_v1 }
 0xc08   :  { %3944 = vmatprep.subr.bf16.mxu1 %v4330_v0 }
 0xc0b   :  { %3946 = vmatpush3.bf16.msra.mxu1 %v4490_v12 }
 0xc0c   :  { %v1471_v49 = vpop.permute.xlu0 %1470  ;;  %3953 = vmatprep.subr.bf16.mxu1 %v4330_v0 }
 0xc0d   :  { %3724 = vmatmul.mubr.msk.f32.vlgmr.msra.gmra.mrb[12].mxu0 %vm225_vm4, %v1471_v49 }
 0xc0e   :  { %3735 = vmatmul.mubr.msk.f32.vlgmr.msra.gmra.mrb[12].mxu1 %vm225_vm4, %v1471_v49  ;;  %3949 = vmatpush3.bf16.msra.mxu0 %v4534_v62 }
 0xc0f   :  { %3950 = vmatprep.subr.bf16.mxu0 %v4330_v0  ;;  %3745 = vmatprep.mubr.msk.f32.mxu0 %vm4331_vm0, %v4332_v1 }
 0xc10   :  { %3955 = vmatpush3.bf16.msra.mxu1 %v4552_v10  ;;  %3756 = vmatprep.mubr.msk.f32.mxu1 %vm4331_vm0, %v4332_v1 }
 0xc11   :  { %3956 = vmatprep.subr.bf16.mxu1 %v4330_v0 }
 0xc12   :  { %3952 = vmatpush3.bf16.msra.mxu0 %v4550_v9 }
 0xc13   :  { %3959 = vmatprep.subr.bf16.mxu0 %v4330_v0 }
 0xc14   :  { %3958 = vmatpush3.bf16.msra.mxu1 %v4556_v14 }
 0xc15   :  { %3965 = vmatprep.subr.bf16.mxu1 %v4330_v0 }
 0xcd9   :  { %v1461_v29 = vpop.f32.mrb[10].mxu1 }
 0xcda   :  { %v3714_v51 = vpop.f32.mrb[11].mxu1 }
 0xce0   :  { %v1540_v42 = vpop.f32.mrb[12].mxu0 }
 0xce1   :  { %v1541_v43 = vadd.f32 %v1540_v42, %v1461_v29  ;;  %v1644_v44 = vpop.f32.mrb[12].mxu1  ;;  %v3725_v28 = vpop.f32.mrb[13].mxu0 }
 0xce2   :  { %v1649_v55 = vrot.slane %v1644_v44, 4  ;;  %v1650_v57 = vrot.slane %v1644_v44, 5  ;;  %v3736_v58 = vpop.f32.mrb[13].mxu1 }
 0xce3   :  { %v1544_v56 = vadd.f32 %v4594_v30, %v1541_v43 }
 0xce4   :  { %v1653_v18 = vadd.f32 %v1649_v55, %v4508_v19  ;;  %v1654_v45 = vadd.f32 %v1650_v57, %v4510_v20 }
 0xce5   :  { %v3393_v26 = vmul.f32 -1.442695, %v1544_v56 }
 0xce6   :  { %v3398_v52 = vmul.f32 -1.442695, %v1653_v18  ;;  %v3399_v50 = vmul.f32 -1.442695, %v1654_v45 }
 0xce7   :  { %4123 = vpow2.f32 %v3393_v26 }
 0xce8   :  { %4125 = vpow2.f32 %v3398_v52 }
 0xce9   :  { %4127 = vpow2.f32 %v3399_v50 }
 0xcf1   :  { %v4124_v53 = vpop.eup %4123 }
 0xcf2   :  { %v4126_v59 = vpop.eup %4125  ;;  %v1548_v60 = vadd.f32 1.0, %v4124_v53 }
 0xcf3   :  { %v4128_v61 = vpop.eup %4127  ;;  %v1661_v63 = vadd.f32 1.0, %v4126_v59 }
 0xcf4   :  { %4129 = vrcp.f32 %v1548_v60  ;;  %v1662_v2 = vadd.f32 1.0, %v4128_v61 }
 0xcf5   :  { %4131 = vrcp.f32 %v1661_v63 }
 0xcf6   :  { %4133 = vrcp.f32 %v1662_v2 }
 0xcfe   :  { %v4828_v30 = vpop.eup %4129 }
 0xcff   :  { %v4830_v3 = vpop.eup %4131  ;;  %v1551_v4 = vmul.f32 2.0, %v4828_v30  ;;  %v1553_v35 = vmul.f32 %v4828_v30, %v4774_v48 }
 0xd00   :  { %v4833_v6 = vpop.eup %4133  ;;  %v1667_v7 = vmul.f32 2.0, %v4830_v3  ;;  %v1677_v36 = vmul.f32 %v4830_v3, %v1673_v34 }
 0xd01   :  { %v3394_v8 = vadd.f32 -1.0, %v1551_v4  ;;  %v1668_v11 = vmul.f32 2.0, %v4833_v6  ;;  %v1678_v25 = vmul.f32 %v4833_v6, %v1674_v38 }
 0xd02   :  { %v3400_v13 = vadd.f32 -1.0, %v1667_v7 }
 0xd03   :  { %1555 = vrot.lane.b32.xlu1 %v3394_v8, %s4333_s5  ;;  %v3401_v15 = vadd.f32 -1.0, %v1668_v11 }
 0xd04   :  { %1681 = vrot.lane.b32.xlu0 %v3400_v13, %s4333_s5 }
 0xd07   :  { %1683 = vrot.lane.b32.xlu1 %v3401_v15, %s4333_s5 }
 0xd75   :  { %v1556_v16 = vpop.permute.xlu1 %1555 }
 0xd76   :  { %v1558_v17 = vmul.f32 %v4828_v30, %v1556_v16  ;;  %v1682_v24 = vpop.permute.xlu0 %1681 }
 0xd77   :  { %v1687_v46 = vmul.f32 %v4830_v3, %v1682_v24 }
 0xd78   :  { %1560 = vrot.lane.b32.xlu0 %v1558_v17, %s4324_s29 }
 0xd79   :  { %1691 = vrot.lane.b32.xlu1 %v1687_v46, %s4324_s29  ;;  %v1684_v31 = vpop.permute.xlu1 %1683 }
 0xd7a   :  { %v1688_v32 = vmul.f32 %v4833_v6, %v1684_v31 }
 0xd7c   :  { %1693 = vrot.lane.b32.xlu0 %v1688_v32, %s4324_s29 }
 0xdea   :  { %v1561_v37 = vpop.permute.xlu0 %1560 }
 0xdeb   :  { %v1692_v39 = vpop.permute.xlu1 %1691  ;;  %v4851_v40 = vadd.f32 %v1561_v37, %v1553_v35 }
 0xdec   :  { %v4853_v22 = vadd.f32 %v1692_v39, %v1677_v36 }
 0xded   :  { %v3395_v41 = vmul.f32 -2.0, %v4851_v40 }
 0xdee   :  { %v3402_v49 = vmul.f32 -2.0, %v4853_v22  ;;  %v1694_v54 = vpop.permute.xlu0 %1693 }
 0xdef   :  { %v1566_v29 = vmul.f32 1.442695, %v3395_v41  ;;  %v4858_v51 = vadd.f32 %v1694_v54, %v1678_v25 }
 0xdf0   :  { %v1703_v48 = vmul.f32 1.442695, %v3402_v49  ;;  %v4905_v49 = vld [vmem:[%s5175_s8] ss:$0 sm:$0xff] }
 0xdf1   :  { %4135 = vpow2.f32 %v1566_v29  ;;  %v3403_v42 = vmul.f32 -2.0, %v4858_v51 }
 0xdf2   :  { %4137 = vpow2.f32 %v1703_v48 }
 0xdf3   :  { %v1705_v21 = vmul.f32 1.442695, %v3403_v42 }
 0xdf5   :  { %4139 = vpow2.f32 %v1705_v21 }
 0xdfb   :  { %v4136_v43 = vpop.eup %4135 }
 0xdfc   :  { %v4138_v44 = vpop.eup %4137  ;;  %v1568_v28 = vadd.f32 1.0, %v4136_v43 }
 0xdfd   :  { %v1707_v55 = vadd.f32 1.0, %v4138_v44 }
 0xdfe   :  { %4141 = vrcp.f32 %v1568_v28 }
 0xdff   :  { %v4140_v57 = vpop.eup %4139  ;;  %4143 = vrcp.f32 %v1707_v55 }
 0xe00   :  { %v1708_v58 = vadd.f32 1.0, %v4140_v57 }
 0xe02   :  { %4145 = vrcp.f32 %v1708_v58 }
 0xe08   :  { %v4142_v56 = vpop.eup %4141 }
 0xe09   :  { %v4144_v18 = vpop.eup %4143  ;;  %v1571_v45 = vmul.f32 2.0, %v4142_v56 }
 0xe0a   :  { %v1713_v26 = vmul.f32 2.0, %v4144_v18 }
 0xe0b   :  { %v3396_v52 = vadd.f32 -1.0, %v1571_v45 }
 0xe0c   :  { %v4146_v50 = vpop.eup %4145  ;;  %v3404_v53 = vadd.f32 -1.0, %v1713_v26 }
 0xe0d   :  { %1574 = vrot.lane.b32.xlu1 %v3396_v52, %s4333_s5  ;;  %v1714_v59 = vmul.f32 2.0, %v4146_v50 }
 0xe0e   :  { %1719 = vrot.lane.b32.xlu0 %v3404_v53, %s4333_s5 }
 0xe0f   :  { %v3405_v60 = vadd.f32 -1.0, %v1714_v59 }
 0xe11   :  { %1721 = vrot.lane.b32.xlu1 %v3405_v60, %s4333_s5 }
 0xe7f   :  { %v1575_v61 = vpop.permute.xlu1 %1574 }
 0xe80   :  { %v1577_v63 = vmul.f32 %v4828_v30, %v1575_v61  ;;  %v1720_v2 = vpop.permute.xlu0 %1719 }
 0xe81   :  { %v1725_v7 = vmul.f32 %v4830_v3, %v1720_v2 }
 0xe82   :  { %v3033_v4 = vrot.slane %v1577_v63, %v4704_v27  ;;  %1728 = vrot.lane.b32.xlu0 %v1577_v63, %s4324_s29 }
 0xe83   :  { %v1722_v8 = vpop.permute.xlu1 %1721  ;;  %v1804_v24 = vrot.slane %v1725_v7, 4 }
 0xe84   :  { %v3034_v11 = vcombine.high %v3033_v4, %v3033_v4  ;;  %v3041_v13 = vrot.slane %v3033_v4, %v4704_v27  ;;  %v1726_v15 = vmul.f32 %v4833_v6, %v1722_v8 }
 0xe86   :  { %v3048_v16 = vrot.slane %v3034_v11, %v4704_v27  ;;  %v3160_v17 = vrot.slane %v3041_v13, %v4709_v33  ;;  %v1805_v30 = vrot.slane %v1726_v15, 3  ;;  %v2010_v13 = vrot.slane %v4853_v22, 7 }
 0xe88   :  { %v3164_v46 = vrot.slane %v3048_v16, %v4709_v33  ;;  %v1806_v31 = vsel %vm455_vm5, %v1805_v30, %v1804_v24  ;;  %v4875_v3 = vsel %vm3213_vm8, %v4797_v23, %v3160_v17  ;;  %v2011_v24 = vrot.slane %v4858_v51, 7 }
 0xe89   :  { %1807 = vrot.lane.b32.xlu1 %v1806_v31, %s4324_s29 }
 0xe8a   :  { %v4879_v32 = vsel %vm3213_vm8, %v4802_v47, %v3164_v46 }
 0xef4   :  { %v1729_v6 = vpop.permute.xlu0 %1728 }
 0xef5   :  { %3746 = vmatmul.mubr.msk.f32.vlgmr.msra.gmra.mrb[14].mxu0 %vm225_vm4, %v1729_v6 }
 0xef6   :  { %3961 = vmatpush3.bf16.msra.mxu0 %v4471_v5  ;;  %3767 = vmatprep.mubr.msk.f32.mxu0 %vm4331_vm0, %v4332_v1 }
 0xef7   :  { %3962 = vmatprep.subr.bf16.mxu0 %v4330_v0 }
 0xefa   :  { %3964 = vmatpush3.bf16.msra.mxu0 %v4490_v12 }
 0xefb   :  { %v1808_v34 = vpop.permute.xlu1 %1807  ;;  %3971 = vmatprep.subr.bf16.mxu0 %v4330_v0 }
 0xefc   :  { %3757 = vmatmul.mubr.msk.f32.vlgmr.msra.gmra.mrb[14].mxu1 %vm225_vm4, %v1808_v34 }
 0xefd   :  { %3768 = vmatmul.mubr.msk.f32.vlgmr.msra.gmra.mrb[16].mxu0 %vm225_vm4, %v1808_v34  ;;  %3967 = vmatpush3.bf16.msra.mxu1 %v4534_v62 }
 0xefe   :  { %3968 = vmatprep.subr.bf16.mxu1 %v4330_v0  ;;  %3778 = vmatprep.mubr.msk.f32.mxu1 %vm4331_vm0, %v4332_v1 }
 0xeff   :  { %3973 = vmatpush3.bf16.msra.mxu0 %v4552_v10  ;;  %3789 = vmatprep.mubr.msk.f32.mxu0 %vm4331_vm0, %v4332_v1 }
 0xf00   :  { %3974 = vmatprep.subr.bf16.mxu0 %v4330_v0 }
 0xf01   :  { %3970 = vmatpush3.bf16.msra.mxu1 %v4550_v9 }
 0xf02   :  { %3977 = vmatprep.subr.bf16.mxu1 %v4330_v0 }
 0xf03   :  { %3976 = vmatpush3.bf16.msra.mxu0 %v4556_v14 }
 0xf04   :  { %3983 = vmatprep.subr.bf16.mxu0 %v4330_v0 }
 0xfc8   :  { %v1798_v23 = vpop.f32.mrb[14].mxu0 }
 0xfc9   :  { %v3747_v47 = vpop.f32.mrb[15].mxu0 }
 0xfcf   :  { %v1877_v35 = vpop.f32.mrb[14].mxu1 }
 0xfd0   :  { %v1878_v36 = vadd.f32 %v1877_v35, %v1798_v23  ;;  %v1981_v37 = vpop.f32.mrb[16].mxu0  ;;  %v3758_v38 = vpop.f32.mrb[15].mxu1 }
 0xfd1   :  { %v1986_v39 = vrot.slane %v1981_v37, 3  ;;  %v1987_v41 = vrot.slane %v1981_v37, 4  ;;  %v3769_v25 = vpop.f32.mrb[17].mxu0 }
 0xfd2   :  { %v1881_v54 = vadd.f32 %v4905_v49, %v1878_v36 }
 0xfd3   :  { %v1990_v29 = vadd.f32 %v1986_v39, %v4508_v19  ;;  %v1991_v48 = vadd.f32 %v1987_v41, %v4510_v20 }
 0xfd4   :  { %v3408_v42 = vmul.f32 -1.442695, %v1881_v54 }
 0xfd5   :  { %v3413_v21 = vmul.f32 -1.442695, %v1990_v29  ;;  %v3414_v43 = vmul.f32 -1.442695, %v1991_v48 }
 0xfd6   :  { %4147 = vpow2.f32 %v3408_v42 }
 0xfd7   :  { %4149 = vpow2.f32 %v3413_v21 }
 0xfd8   :  { %4151 = vpow2.f32 %v3414_v43 }
 0xfe0   :  { %v4148_v44 = vpop.eup %4147 }
 0xfe1   :  { %v4150_v28 = vpop.eup %4149  ;;  %v1885_v55 = vadd.f32 1.0, %v4148_v44 }
 0xfe2   :  { %v4152_v57 = vpop.eup %4151  ;;  %v1998_v58 = vadd.f32 1.0, %v4150_v28 }
 0xfe3   :  { %4153 = vrcp.f32 %v1885_v55  ;;  %v1999_v56 = vadd.f32 1.0, %v4152_v57 }
 0xfe4   :  { %4155 = vrcp.f32 %v1998_v58 }
 0xfe5   :  { %4157 = vrcp.f32 %v1999_v56 }
 0xfed   :  { %v4910_v18 = vpop.eup %4153 }
 0xfee   :  { %v4912_v45 = vpop.eup %4155  ;;  %v1888_v26 = vmul.f32 2.0, %v4910_v18  ;;  %v1890_v15 = vmul.f32 %v4910_v18, %v4851_v40 }
 0xfef   :  { %v4915_v52 = vpop.eup %4157  ;;  %v2004_v50 = vmul.f32 2.0, %v4912_v45  ;;  %v2014_v17 = vmul.f32 %v4912_v45, %v2010_v13 }
 0xff0   :  { %v3409_v53 = vadd.f32 -1.0, %v1888_v26  ;;  %v2005_v59 = vmul.f32 2.0, %v4915_v52  ;;  %v2015_v34 = vmul.f32 %v4915_v52, %v2011_v24 }
 0xff1   :  { %v3415_v60 = vadd.f32 -1.0, %v2004_v50 }
 0xff2   :  { %1892 = vrot.lane.b32.xlu0 %v3409_v53, %s4333_s5  ;;  %v3416_v61 = vadd.f32 -1.0, %v2005_v59 }
 0xff3   :  { %2018 = vrot.lane.b32.xlu1 %v3415_v60, %s4333_s5 }
 0xff6   :  { %2020 = vrot.lane.b32.xlu0 %v3416_v61, %s4333_s5 }
0x1064   :  { %v1893_v63 = vpop.permute.xlu0 %1892 }
0x1065   :  { %v2019_v2 = vpop.permute.xlu1 %2018  ;;  %v1895_v4 = vmul.f32 %v4910_v18, %v1893_v63 }
0x1066   :  { %v2024_v7 = vmul.f32 %v4912_v45, %v2019_v2 }
0x1067   :  { %1897 = vrot.lane.b32.xlu1 %v1895_v4, %s4324_s29 }
0x1068   :  { %2028 = vrot.lane.b32.xlu0 %v2024_v7, %s4324_s29  ;;  %v2021_v8 = vpop.permute.xlu0 %2020 }
0x1069   :  { %v2025_v11 = vmul.f32 %v4915_v52, %v2021_v8 }
0x106b   :  { %2030 = vrot.lane.b32.xlu1 %v2025_v11, %s4324_s29 }
0x10d9   :  { %v1898_v16 = vpop.permute.xlu1 %1897 }
0x10da   :  { %v4933_v30 = vadd.f32 %v1898_v16, %v1890_v15  ;;  %v2029_v46 = vpop.permute.xlu0 %2028 }
0x10db   :  { %v4935_v31 = vadd.f32 %v2029_v46, %v2014_v17 }
0x10dc   :  { %v3410_v6 = vmul.f32 -2.0, %v4933_v30 }
0x10dd   :  { %v3417_v23 = vmul.f32 -2.0, %v4935_v31  ;;  %v2031_v22 = vpop.permute.xlu1 %2030 }
0x10de   :  { %v1903_v47 = vmul.f32 1.442695, %v3410_v6  ;;  %v4940_v35 = vadd.f32 %v2031_v22, %v2015_v34 }
0x10df   :  { %v2040_v40 = vmul.f32 1.442695, %v3417_v23 }
0x10e0   :  { %4159 = vpow2.f32 %v1903_v47  ;;  %v3418_v36 = vmul.f32 -2.0, %v4940_v35 }
0x10e1   :  { %4161 = vpow2.f32 %v2040_v40 }
0x10e2   :  { %v2042_v51 = vmul.f32 1.442695, %v3418_v36 }
0x10e4   :  { %4163 = vpow2.f32 %v2042_v51 }
0x10ea   :  { %v4160_v37 = vpop.eup %4159 }
0x10eb   :  { %v4162_v38 = vpop.eup %4161  ;;  %v1905_v39 = vadd.f32 1.0, %v4160_v37 }
0x10ec   :  { %v2044_v41 = vadd.f32 1.0, %v4162_v38 }
0x10ed   :  { %4165 = vrcp.f32 %v1905_v39 }
0x10ee   :  { %v4164_v25 = vpop.eup %4163  ;;  %4167 = vrcp.f32 %v2044_v41 }
0x10ef   :  { %v2045_v54 = vadd.f32 1.0, %v4164_v25 }
0x10f1   :  { %4169 = vrcp.f32 %v2045_v54 }
0x10f7   :  { %v4166_v29 = vpop.eup %4165 }
0x10f8   :  { %v4168_v48 = vpop.eup %4167  ;;  %v1908_v42 = vmul.f32 2.0, %v4166_v29 }
0x10f9   :  { %v2050_v21 = vmul.f32 2.0, %v4168_v48 }
0x10fa   :  { %v3411_v43 = vadd.f32 -1.0, %v1908_v42 }
0x10fb   :  { %v4170_v44 = vpop.eup %4169  ;;  %v3419_v28 = vadd.f32 -1.0, %v2050_v21 }
0x10fc   :  { %1911 = vrot.lane.b32.xlu0 %v3411_v43, %s4333_s5  ;;  %v2051_v55 = vmul.f32 2.0, %v4170_v44 }
0x10fd   :  { %2056 = vrot.lane.b32.xlu1 %v3419_v28, %s4333_s5 }
0x10fe   :  { %v3420_v57 = vadd.f32 -1.0, %v2051_v55 }
0x1100   :  { %2058 = vrot.lane.b32.xlu0 %v3420_v57, %s4333_s5 }
0x116e   :  { %v1912_v58 = vpop.permute.xlu0 %1911 }
0x116f   :  { %v2057_v56 = vpop.permute.xlu1 %2056  ;;  %v1914_v26 = vmul.f32 %v4910_v18, %v1912_v58 }
0x1170   :  { %v2062_v50 = vmul.f32 %v4912_v45, %v2057_v56 }
0x1171   :  { %v3055_v53 = vrot.slane %v1914_v26, %v4704_v27  ;;  %2065 = vrot.lane.b32.xlu1 %v1914_v26, %s4324_s29 }
0x1172   :  { %v2059_v59 = vpop.permute.xlu0 %2058  ;;  %v2141_v2 = vrot.slane %v2062_v50, 5 }
0x1173   :  { %v3056_v60 = vcombine.high %v3055_v53, %v3055_v53  ;;  %v3063_v61 = vrot.slane %v3055_v53, %v4704_v27  ;;  %v2063_v63 = vmul.f32 %v4915_v52, %v2059_v59 }
0x1175   :  { %v3070_v4 = vrot.slane %v3056_v60, %v4704_v27  ;;  %v3170_v7 = vrot.slane %v3063_v61, %v4709_v33  ;;  %v2142_v8 = vrot.slane %v2063_v63, 4  ;;  %v2347_v61 = vrot.slane %v4935_v31, 7 }
0x1177   :  { %v3174_v18 = vrot.slane %v3070_v4, %v4709_v33  ;;  %v2143_v45 = vsel %vm455_vm5, %v2142_v8, %v2141_v2  ;;  %v4958_v11 = vsel %vm133_vm1, %v4875_v3, %v3170_v7  ;;  %v2348_v7 = vrot.slane %v4940_v35, 7 }
0x1178   :  { %2144 = vrot.lane.b32.xlu0 %v2143_v45, %s4324_s29 }
0x1179   :  { %v4963_v13 = vsel %vm133_vm1, %v4879_v32, %v3174_v18 }
0x11e3   :  { %v2066_v52 = vpop.permute.xlu1 %2065 }
0x11e4   :  { %3779 = vmatmul.mubr.msk.f32.vlgmr.msra.gmra.mrb[16].mxu1 %vm225_vm4, %v2066_v52 }
0x11e5   :  { %3979 = vmatpush3.bf16.msra.mxu1 %v4471_v5  ;;  %3800 = vmatprep.mubr.msk.f32.mxu1 %vm4331_vm0, %v4332_v1 }
0x11e6   :  { %3980 = vmatprep.subr.bf16.mxu1 %v4330_v0 }
0x11e9   :  { %3982 = vmatpush3.bf16.msra.mxu1 %v4490_v12 }
0x11ea   :  { %v2145_v3 = vpop.permute.xlu0 %2144  ;;  %3989 = vmatprep.subr.bf16.mxu1 %v4330_v0 }
0x11eb   :  { %3790 = vmatmul.mubr.msk.f32.vlgmr.msra.gmra.mrb[18].mxu0 %vm225_vm4, %v2145_v3 }
0x11ec   :  { %3801 = vmatmul.mubr.msk.f32.vlgmr.msra.gmra.mrb[18].mxu1 %vm225_vm4, %v2145_v3  ;;  %3985 = vmatpush3.bf16.msra.mxu0 %v4534_v62 }
0x11ed   :  { %3986 = vmatprep.subr.bf16.mxu0 %v4330_v0  ;;  %3811 = vmatprep.mubr.msk.f32.mxu0 %vm4331_vm0, %v4332_v1 }
0x11ee   :  { %3991 = vmatpush3.bf16.msra.mxu1 %v4552_v10  ;;  %3822 = vmatprep.mubr.msk.f32.mxu1 %vm4331_vm0, %v4332_v1 }
0x11ef   :  { %3992 = vmatprep.subr.bf16.mxu1 %v4330_v0 }
0x11f0   :  { %3988 = vmatpush3.bf16.msra.mxu0 %v4550_v9 }
0x11f1   :  { %3995 = vmatprep.subr.bf16.mxu0 %v4330_v0 }
0x11f2   :  { %3994 = vmatpush3.bf16.msra.mxu1 %v4556_v14 }
0x11f3   :  { %4001 = vmatprep.subr.bf16.mxu1 %v4330_v0 }
0x12b7   :  { %v2135_v32 = vpop.f32.mrb[16].mxu1 }
0x12b8   :  { %v3780_v15 = vpop.f32.mrb[17].mxu1 }
0x12be   :  { %v2214_v16 = vpop.f32.mrb[18].mxu0 }
0x12bf   :  { %v2215_v17 = vadd.f32 %v2214_v16, %v2135_v32  ;;  %v2318_v24 = vpop.f32.mrb[18].mxu1  ;;  %v3791_v46 = vpop.f32.mrb[19].mxu0 }
0x12c0   :  { %v2323_v6 = vrot.slane %v2318_v24, 2  ;;  %v2324_v34 = vrot.slane %v2318_v24, 3  ;;  %v3802_v23 = vpop.f32.mrb[19].mxu1 }
0x12c1   :  { %v2218_v22 = vadd.f32 %v4905_v49, %v2215_v17 }
0x12c2   :  { %v2327_v47 = vadd.f32 %v2323_v6, %v4508_v19  ;;  %v2328_v40 = vadd.f32 %v2324_v34, %v4510_v20 }
0x12c3   :  { %v3423_v36 = vmul.f32 -1.442695, %v2218_v22 }
0x12c4   :  { %v3428_v51 = vmul.f32 -1.442695, %v2327_v47  ;;  %v3429_v37 = vmul.f32 -1.442695, %v2328_v40 }
0x12c5   :  { %4171 = vpow2.f32 %v3423_v36 }
0x12c6   :  { %4173 = vpow2.f32 %v3428_v51 }
0x12c7   :  { %4175 = vpow2.f32 %v3429_v37 }
0x12cf   :  { %v4172_v38 = vpop.eup %4171 }
0x12d0   :  { %v4174_v39 = vpop.eup %4173  ;;  %v2222_v41 = vadd.f32 1.0, %v4172_v38 }
0x12d1   :  { %v4176_v25 = vpop.eup %4175  ;;  %v2335_v54 = vadd.f32 1.0, %v4174_v39 }
0x12d2   :  { %4177 = vrcp.f32 %v2222_v41  ;;  %v2336_v29 = vadd.f32 1.0, %v4176_v25 }
0x12d3   :  { %4179 = vrcp.f32 %v2335_v54 }
0x12d4   :  { %4181 = vrcp.f32 %v2336_v29 }
0x12dc   :  { %v4989_v48 = vpop.eup %4177 }
0x12dd   :  { %v4991_v42 = vpop.eup %4179  ;;  %v2225_v21 = vmul.f32 2.0, %v4989_v48  ;;  %v2227_v63 = vmul.f32 %v4989_v48, %v4933_v30 }
0x12de   :  { %v4994_v43 = vpop.eup %4181  ;;  %v2341_v44 = vmul.f32 2.0, %v4991_v42  ;;  %v2351_v2 = vmul.f32 %v4991_v42, %v2347_v61 }
0x12df   :  { %v3424_v28 = vadd.f32 -1.0, %v2225_v21  ;;  %v2342_v55 = vmul.f32 2.0, %v4994_v43  ;;  %v2352_v3 = vmul.f32 %v4994_v43, %v2348_v7 }
0x12e0   :  { %v3430_v57 = vadd.f32 -1.0, %v2341_v44 }
0x12e1   :  { %2229 = vrot.lane.b32.xlu1 %v3424_v28, %s4333_s5  ;;  %v3431_v58 = vadd.f32 -1.0, %v2342_v55 }
0x12e2   :  { %2355 = vrot.lane.b32.xlu0 %v3430_v57, %s4333_s5 }
0x12e5   :  { %2357 = vrot.lane.b32.xlu1 %v3431_v58, %s4333_s5 }
0x1353   :  { %v2230_v56 = vpop.permute.xlu1 %2229 }
0x1354   :  { %v2232_v26 = vmul.f32 %v4989_v48, %v2230_v56  ;;  %v2356_v50 = vpop.permute.xlu0 %2355 }
0x1355   :  { %v2361_v53 = vmul.f32 %v4991_v42, %v2356_v50 }
0x1356   :  { %2234 = vrot.lane.b32.xlu0 %v2232_v26, %s4324_s29 }
0x1357   :  { %2365 = vrot.lane.b32.xlu1 %v2361_v53, %s4324_s29  ;;  %v2358_v59 = vpop.permute.xlu1 %2357 }
0x1358   :  { %v2362_v60 = vmul.f32 %v4994_v43, %v2358_v59 }
0x135a   :  { %2367 = vrot.lane.b32.xlu0 %v2362_v60, %s4324_s29 }
0x13c8   :  { %v2235_v4 = vpop.permute.xlu0 %2234 }
0x13c9   :  { %v2366_v8 = vpop.permute.xlu1 %2365  ;;  %v5012_v18 = vadd.f32 %v2235_v4, %v2227_v63 }
0x13ca   :  { %v5014_v45 = vadd.f32 %v2366_v8, %v2351_v2 }
0x13cb   :  { %v3425_v52 = vmul.f32 -2.0, %v5012_v18 }
0x13cc   :  { %v3432_v32 = vmul.f32 -2.0, %v5014_v45  ;;  %v2368_v31 = vpop.permute.xlu0 %2367 }
0x13cd   :  { %v2240_v15 = vmul.f32 1.442695, %v3425_v52  ;;  %v5019_v16 = vadd.f32 %v2368_v31, %v2352_v3 }
0x13ce   :  { %v2377_v30 = vmul.f32 1.442695, %v3432_v32 }
0x13cf   :  { %4183 = vpow2.f32 %v2240_v15  ;;  %v3433_v17 = vmul.f32 -2.0, %v5019_v16 }
0x13d0   :  { %4185 = vpow2.f32 %v2377_v30 }
0x13d1   :  { %v2379_v35 = vmul.f32 1.442695, %v3433_v17 }
0x13d3   :  { %4187 = vpow2.f32 %v2379_v35 }
0x13d9   :  { %v4184_v24 = vpop.eup %4183 }
0x13da   :  { %v4186_v46 = vpop.eup %4185  ;;  %v2242_v6 = vadd.f32 1.0, %v4184_v24 }
0x13db   :  { %v2381_v34 = vadd.f32 1.0, %v4186_v46 }
0x13dc   :  { %4189 = vrcp.f32 %v2242_v6 }
0x13dd   :  { %v4188_v23 = vpop.eup %4187  ;;  %4191 = vrcp.f32 %v2381_v34 }
0x13de   :  { %v2382_v22 = vadd.f32 1.0, %v4188_v23 }
0x13e0   :  { %4193 = vrcp.f32 %v2382_v22 }
0x13e6   :  { %v4190_v47 = vpop.eup %4189 }
0x13e7   :  { %v4192_v40 = vpop.eup %4191  ;;  %v2245_v36 = vmul.f32 2.0, %v4190_v47 }
0x13e8   :  { %v2387_v51 = vmul.f32 2.0, %v4192_v40 }
0x13e9   :  { %v3426_v37 = vadd.f32 -1.0, %v2245_v36 }
0x13ea   :  { %v4194_v38 = vpop.eup %4193  ;;  %v3434_v39 = vadd.f32 -1.0, %v2387_v51 }
0x13eb   :  { %2248 = vrot.lane.b32.xlu1 %v3426_v37, %s4333_s5  ;;  %v2388_v41 = vmul.f32 2.0, %v4194_v38 }
0x13ec   :  { %2393 = vrot.lane.b32.xlu0 %v3434_v39, %s4333_s5  ;;  %v2684_v39 = vrot.slane %v5014_v45, 7 }
0x13ed   :  { %v3435_v25 = vadd.f32 -1.0, %v2388_v41  ;;  %v2685_v41 = vrot.slane %v5019_v16, 7 }
0x13ef   :  { %2395 = vrot.lane.b32.xlu1 %v3435_v25, %s4333_s5 }
0x145d   :  { %v2249_v54 = vpop.permute.xlu1 %2248 }
0x145e   :  { %v2251_v29 = vmul.f32 %v4989_v48, %v2249_v54  ;;  %v2394_v21 = vpop.permute.xlu0 %2393 }
0x145f   :  { %v2399_v28 = vmul.f32 %v4991_v42, %v2394_v21 }
0x1460   :  { %v3077_v44 = vrot.slane %v2251_v29, %v4704_v27  ;;  %2402 = vrot.lane.b32.xlu0 %v2251_v29, %s4324_s29 }
0x1461   :  { %v2396_v55 = vpop.permute.xlu1 %2395  ;;  %v2478_v53 = vrot.slane %v2399_v28, 6 }
0x1462   :  { %v3078_v57 = vcombine.high %v3077_v44, %v3077_v44  ;;  %v3085_v58 = vrot.slane %v3077_v44, %v4704_v27  ;;  %v2400_v56 = vmul.f32 %v4994_v43, %v2396_v55 }
0x1464   :  { %v3092_v26 = vrot.slane %v3078_v57, %v4704_v27  ;;  %v3180_v50 = vrot.slane %v3085_v58, %v4709_v33  ;;  %v2479_v48 = vrot.slane %v2400_v56, 5 }
0x1466   :  { %v3184_v59 = vrot.slane %v3092_v26, %v4709_v33  ;;  %v2480_v60 = vsel %vm455_vm5, %v2479_v48, %v2478_v53  ;;  %v5036_v42 = vsel %vm3218_vm9, %v4958_v11, %v3180_v50 }
0x1467   :  { %2481 = vrot.lane.b32.xlu1 %v2480_v60, %s4324_s29 }
0x1468   :  { %v5040_v61 = vsel %vm3218_vm9, %v4963_v13, %v3184_v59 }
0x14d2   :  { %v2403_v43 = vpop.permute.xlu0 %2402 }
0x14d3   :  { %3812 = vmatmul.mubr.msk.f32.vlgmr.msra.gmra.mrb[20].mxu0 %vm225_vm4, %v2403_v43 }
0x14d4   :  { %3997 = vmatpush3.bf16.msra.mxu0 %v4471_v5  ;;  %3833 = vmatprep.mubr.msk.f32.mxu0 %vm4331_vm0, %v4332_v1 }
0x14d5   :  { %3998 = vmatprep.subr.bf16.mxu0 %v4330_v0 }
0x14d8   :  { %4000 = vmatpush3.bf16.msra.mxu0 %v4490_v12 }
0x14d9   :  { %v2482_v63 = vpop.permute.xlu1 %2481  ;;  %4007 = vmatprep.subr.bf16.mxu0 %v4330_v0 }
0x14da   :  { %3823 = vmatmul.mubr.msk.f32.vlgmr.msra.gmra.mrb[20].mxu1 %vm225_vm4, %v2482_v63 }
0x14db   :  { %3834 = vmatmul.mubr.msk.f32.vlgmr.msra.gmra.mrb[22].mxu0 %vm225_vm4, %v2482_v63  ;;  %4003 = vmatpush3.bf16.msra.mxu1 %v4534_v62 }
0x14dc   :  { %4009 = vmatpush3.bf16.msra.mxu0 %v4552_v10  ;;  %4004 = vmatprep.subr.bf16.mxu1 %v4330_v0 }
0x14dd   :  { %4010 = vmatprep.subr.bf16.mxu0 %v4330_v0  ;;  %3855 = vmatprep.mubr.msk.f32.mxu0 %vm4331_vm0, %v4332_v1 }
0x14de   :  { %3844 = vmatprep.mubr.msk.f32.mxu1 %vm4331_vm0, %v4332_v1 }
0x14df   :  { %4006 = vmatpush3.bf16.msra.mxu1 %v4550_v9 }
0x14e0   :  { %4012 = vmatpush3.bf16.msra.mxu0 %v4556_v14 }
0x15a6   :  { %v2472_v5 = vpop.f32.mrb[20].mxu0 }
0x15a7   :  { %v3813_v12 = vpop.f32.mrb[21].mxu0 }
0x15ad   :  { %v2551_v11 = vpop.f32.mrb[20].mxu1 }
0x15ae   :  { %v2552_v62 = vadd.f32 %v2551_v11, %v2472_v5  ;;  %v2655_v13 = vpop.f32.mrb[22].mxu0  ;;  %v3824_v10 = vpop.f32.mrb[21].mxu1 }
0x15af   :  { %v2660_v2 = vrot.slane %v2655_v13, 1  ;;  %v2661_v4 = vrot.slane %v2655_v13, 2  ;;  %v3835_v7 = vpop.f32.mrb[23].mxu0 }
0x15b0   :  { %v2555_v0 = vadd.f32 %v4905_v49, %v2552_v62 }
0x15b1   :  { %v2664_v8 = vadd.f32 %v2660_v2, %v4508_v19  ;;  %v2665_v52 = vadd.f32 %v2661_v4, %v4510_v20 }
0x15b2   :  { %v3438_v1 = vmul.f32 -1.442695, %v2555_v0 }
0x15b3   :  { %v3443_v3 = vmul.f32 -1.442695, %v2664_v8  ;;  %v3444_v9 = vmul.f32 -1.442695, %v2665_v52 }
0x15b4   :  { %4195 = vpow2.f32 %v3438_v1 }
0x15b5   :  { %4197 = vpow2.f32 %v3443_v3 }
0x15b6   :  { %4199 = vpow2.f32 %v3444_v9 }
0x15be   :  { %v4196_v14 = vpop.eup %4195 }
0x15bf   :  { %v4198_v32 = vpop.eup %4197  ;;  %v2559_v31 = vadd.f32 1.0, %v4196_v14 }
0x15c0   :  { %v4200_v15 = vpop.eup %4199  ;;  %v2672_v30 = vadd.f32 1.0, %v4198_v32 }
0x15c1   :  { %4201 = vrcp.f32 %v2559_v31  ;;  %v2673_v17 = vadd.f32 1.0, %v4200_v15 }
0x15c2   :  { %4203 = vrcp.f32 %v2672_v30 }
0x15c3   :  { %4205 = vrcp.f32 %v2673_v17 }
0x15cb   :  { %v5064_v35 = vpop.eup %4201 }
0x15cc   :  { %v5066_v19 = vpop.eup %4203  ;;  %v2562_v34 = vmul.f32 2.0, %v5064_v35  ;;  %v2564_v57 = vmul.f32 %v5064_v35, %v5012_v18 }
0x15cd   :  { %v5068_v20 = vpop.eup %4205  ;;  %v2678_v24 = vmul.f32 2.0, %v5066_v19  ;;  %v2688_v25 = vmul.f32 %v5066_v19, %v2684_v39 }
0x15ce   :  { %v2679_v46 = vmul.f32 2.0, %v5068_v20  ;;  %v3439_v22 = vadd.f32 -1.0, %v2562_v34  ;;  %v2689_v29 = vmul.f32 %v5068_v20, %v2685_v41 }
0x15cf   :  { %v3445_v6 = vadd.f32 -1.0, %v2678_v24 }
0x15d0   :  { %v3446_v23 = vadd.f32 -1.0, %v2679_v46 }
0x15d1   :  { %2692 = vrot.lane.b32.xlu0 %v3445_v6, %s4333_s5 }
0x15d2   :  { %2694 = vrot.lane.b32.xlu1 %v3446_v23, %s4333_s5 }
0x15d5   :  { %2566 = vrot.lane.b32.xlu0 %v3439_v22, %s4333_s5 }
0x1643   :  { %v2693_v47 = vpop.permute.xlu0 %2692 }
0x1644   :  { %v2695_v40 = vpop.permute.xlu1 %2694  ;;  %v2698_v36 = vmul.f32 %v5066_v19, %v2693_v47 }
0x1645   :  { %v2699_v51 = vmul.f32 %v5068_v20, %v2695_v40 }
0x1646   :  { %2702 = vrot.lane.b32.xlu1 %v2698_v36, %s4324_s29 }
0x1647   :  { %2704 = vrot.lane.b32.xlu0 %v2699_v51, %s4324_s29  ;;  %v2567_v37 = vpop.permute.xlu0 %2566 }
0x1648   :  { %v2569_v38 = vmul.f32 %v5064_v35, %v2567_v37 }
0x164a   :  { %2571 = vrot.lane.b32.xlu1 %v2569_v38, %s4324_s29 }
0x16b8   :  { %v2703_v54 = vpop.permute.xlu1 %2702 }
0x16b9   :  { %v5086_v21 = vadd.f32 %v2703_v54, %v2688_v25  ;;  %v2705_v44 = vpop.permute.xlu0 %2704 }
0x16ba   :  { %v5088_v28 = vadd.f32 %v2705_v44, %v2689_v29 }
0x16bb   :  { %v3447_v55 = vmul.f32 -2.0, %v5086_v21 }
0x16bc   :  { %v3448_v58 = vmul.f32 -2.0, %v5088_v28  ;;  %v2572_v45 = vpop.permute.xlu1 %2571 }
0x16bd   :  { %v2714_v56 = vmul.f32 1.442695, %v3447_v55  ;;  %v5094_v16 = vadd.f32 %v2572_v45, %v2564_v57 }
0x16be   :  { %v2716_v26 = vmul.f32 1.442695, %v3448_v58 }
0x16bf   :  { %4207 = vpow2.f32 %v2714_v56  ;;  %v3440_v50 = vmul.f32 -2.0, %v5094_v16 }
0x16c0   :  { %4209 = vpow2.f32 %v2716_v26 }
0x16c1   :  { %v2577_v53 = vmul.f32 1.442695, %v3440_v50 }
0x16c3   :  { %4211 = vpow2.f32 %v2577_v53  ;;  %v3227_v53 = vld [vmem:[%s5176_s9] sm:$0xff] }
0x16c9   :  { %v4208_v48 = vpop.eup %4207 }
0x16ca   :  { %v4210_v59 = vpop.eup %4209  ;;  %v2718_v60 = vadd.f32 1.0, %v4208_v48  ;;  %v3229_v48 = vld [vmem:[%s5176_s9 + $0x10] sm:$0xff] }
0x16cb   :  { %v2719_v43 = vadd.f32 1.0, %v4210_v59 }
0x16cc   :  { %4213 = vrcp.f32 %v2718_v60  ;;  %v3230_v60 = vld [vmem:[%s5176_s9 + $0x18] sm:$0xff] }
0x16cd   :  { %v4212_v63 = vpop.eup %4211  ;;  %4215 = vrcp.f32 %v2719_v43  ;;  %v4017_v43 = vpack.c.bf16 %v3230_v60, %v3229_v48 }
0x16ce   :  { %v2579_v18 = vadd.f32 1.0, %v4212_v63 }
0x16d0   :  { %4217 = vrcp.f32 %v2579_v18 }
0x16d6   :  { %v4214_v5 = vpop.eup %4213 }
0x16d7   :  { %v4216_v12 = vpop.eup %4215  ;;  %v2724_v11 = vmul.f32 2.0, %v4214_v5 }
0x16d8   :  { %v2725_v62 = vmul.f32 2.0, %v4216_v12 }
0x16d9   :  { %v3449_v13 = vadd.f32 -1.0, %v2724_v11 }
0x16da   :  { %v4218_v10 = vpop.eup %4217  ;;  %v3450_v2 = vadd.f32 -1.0, %v2725_v62 }
0x16db   :  { %2730 = vrot.lane.b32.xlu0 %v3449_v13, %s4333_s5  ;;  %v2582_v4 = vmul.f32 2.0, %v4218_v10 }
0x16dc   :  { %2732 = vrot.lane.b32.xlu1 %v3450_v2, %s4333_s5 }
0x16dd   :  { %v3441_v7 = vadd.f32 -1.0, %v2582_v4 }
0x16df   :  { %2585 = vrot.lane.b32.xlu0 %v3441_v7, %s4333_s5 }
0x174d   :  { %v2731_v0 = vpop.permute.xlu0 %2730 }
0x174e   :  { %v2733_v8 = vpop.permute.xlu1 %2732  ;;  %v5101_v52 = vmul.f32 %v5066_v19, %v2731_v0  ;;  %v2939_v0 = vrot.slane %v5088_v28, 7 }
0x174f   :  { %v5104_v1 = vmul.f32 %v5068_v20, %v2733_v8 }
0x1750   :  { %v2815_v3 = vrot.slane %v5101_v52, 7 }
0x1751   :  { %v2816_v9 = vrot.slane %v5104_v1, 6  ;;  %v2586_v14 = vpop.permute.xlu0 %2585  ;;  %v2926_v7 = vrot.slane %v5104_v1, 7 }
0x1752   :  { %v2588_v32 = vmul.f32 %v5064_v35, %v2586_v14 }
0x1753   :  { %v2817_v31 = vsel %vm455_vm5, %v2816_v9, %v2815_v3  ;;  %v3457_v9 = vld [vmem:[%s5177_s10] ss:$0 sm:$0xff] }
0x1754   :  { %v3099_v15 = vrot.slane %v2588_v32, %v4704_v27  ;;  %2818 = vrot.lane.b32.xlu0 %v2817_v31, %s4324_s29  ;;  %2739 = vrot.lane.b32.xlu1 %v2588_v32, %s4324_s29 }
0x1756   :  { %v3100_v30 = vcombine.high %v3099_v15, %v3099_v15  ;;  %v3107_v17 = vrot.slane %v3099_v15, %v4704_v27 }
0x1758   :  { %v3114_v19 = vrot.slane %v3100_v30, %v4704_v27  ;;  %v3190_v20 = vrot.slane %v3107_v17, %v4709_v33 }
0x175a   :  { %v3222_v24 = vsel %vm3221_vm10, %v5036_v42, %v3190_v20  ;;  %v3194_v35 = vrot.slane %v3114_v19, %v4709_v33 }
0x175c   :  { %v3223_v46 = vsel %vm3221_vm10, %v5040_v61, %v3194_v35 }
0x17c6   :  { %v2819_v6 = vpop.permute.xlu0 %2818  ;;  %v2740_v34 = vpop.permute.xlu1 %2739 }
0x17c7   :  { %3856 = vmatmul.mubr.msk.f32.vlgmr.msra.gmra.mrb[24].mxu0 %vm225_vm4, %v2819_v6  ;;  %3845 = vmatmul.mubr.msk.f32.vlgmr.msra.gmra.mrb[22].mxu1 %vm225_vm4, %v2740_v34 }
0x189a   :  { %v2888_v23 = vpop.f32.mrb[24].mxu0  ;;  %v2809_v22 = vpop.f32.mrb[22].mxu1 }
0x189b   :  { %v2889_v47 = vadd.f32 %v2888_v23, %v2809_v22  ;;  %v3857_v40 = vpop.f32.mrb[25].mxu0  ;;  %v3846_v36 = vpop.f32.mrb[23].mxu1 }
0x189d   :  { %v2892_v51 = vadd.f32 %v4905_v49, %v2889_v47 }
0x189f   :  { %v3453_v37 = vmul.f32 -1.442695, %v2892_v51 }
0x18a1   :  { %4219 = vpow2.f32 %v3453_v37 }
0x18ab   :  { %v4220_v42 = vpop.eup %4219 }
0x18ac   :  { %v2896_v38 = vadd.f32 1.0, %v4220_v42 }
0x18ae   :  { %4221 = vrcp.f32 %v2896_v38 }
0x18b8   :  { %v4222_v39 = vpop.eup %4221 }
0x18b9   :  { %v2899_v61 = vmul.f32 2.0, %v4222_v39  ;;  %v2901_v29 = vmul.f32 %v4222_v39, %v5094_v16  ;;  %v3228_v16 = vld [vmem:[%s5176_s9 + $0x8] sm:$0xff]  ;;  %s4335_s9 = smov 96  }
0x18ba   :  { %v4013_v59 = vpack.c.bf16 %v3228_v16, %v3227_v53 }
0x18bb   :  { %v3454_v41 = vadd.f32 -1.0, %v2899_v61 }
0x18bc   :  { %4014 = vmatprep.subr.bf16.mxu1 %v4013_v59 }
0x18bd   :  { %2903 = vrot.lane.b32.xlu1 %v3454_v41, %s4333_s5  ;;  %4016 = vmatpush3.bf16.msra.mxu1 %v4013_v59 }
0x18be   :  { %4018 = vmatprep.subr.bf16.mxu1 %v4017_v43 }
0x18c1   :  { %4020 = vmatpush3.bf16.msra.mxu1 %v4017_v43 }
0x192f   :  { %v2904_v25 = vpop.permute.xlu1 %2903 }
0x1930   :  { %v2906_v54 = vmul.f32 %v4222_v39, %v2904_v25 }
0x1932   :  { %2908 = vrot.lane.b32.xlu0 %v2906_v54, %s4324_s29 }
0x19a4   :  { %v2909_v44 = vpop.permute.xlu0 %2908 }
0x19a5   :  { %v2911_v55 = vadd.f32 %v2909_v44, %v2901_v29 }
0x19a7   :  { %v3455_v57 = vmul.f32 -2.0, %v2911_v55 }
0x19a9   :  { %v2914_v49 = vmul.f32 1.442695, %v3455_v57 }
0x19ab   :  { %4223 = vpow2.f32 %v2914_v49 }
0x19b5   :  { %v4224_v58 = vpop.eup %4223 }
0x19b6   :  { %v2916_v45 = vadd.f32 1.0, %v4224_v58 }
0x19b8   :  { %4225 = vrcp.f32 %v2916_v45 }
0x19c2   :  { %v4226_v56 = vpop.eup %4225 }
0x19c3   :  { %v2919_v26 = vmul.f32 2.0, %v4226_v56 }
0x19c5   :  { %v3456_v50 = vadd.f32 -1.0, %v2919_v26 }
0x19c7   :  { %2922 = vrot.lane.b32.xlu1 %v3456_v50, %s4333_s5 }
0x1a39   :  { %v2923_v63 = vpop.permute.xlu1 %2922 }
0x1a3a   :  { %v2925_v18 = vmul.f32 %v4222_v39, %v2923_v63 }
0x1a3c   :  { %v3121_v5 = vrot.slane %v2925_v18, %v4704_v27 }
0x1a3e   :  { %v3122_v12 = vcombine.high %v3121_v5, %v3121_v5  ;;  %v3129_v11 = vrot.slane %v3121_v5, %v4704_v27 }
0x1a40   :  { %v3136_v62 = vrot.slane %v3122_v12, %v4704_v27  ;;  %v3200_v13 = vrot.slane %v3129_v11, %v4709_v33 }
0x1a42   :  { %v3225_v10 = vsel %vm3224_vm11, %v3222_v24, %v3200_v13  ;;  %v3204_v2 = vrot.slane %v3136_v62, %v4709_v33 }
0x1a43   :  { %3240 = vrot.lane.b32.xlu0 %v3225_v10, %s4324_s29 }
0x1a44   :  { %v3226_v4 = vsel %vm3224_vm11, %v3223_v46, %v3204_v2 }
0x1a45   :  { %3242 = vrot.lane.b32.xlu1 %v3226_v4, %s4324_s29 }
0x1a47   :  { %2927 = vrot.lane.b32.xlu0 %v5101_v52, %s4324_s29 }
0x1a49   :  { %2929 = vrot.lane.b32.xlu1 %v2926_v7, %s4324_s29 }
0x1a4b   :  { %2940 = vrot.lane.b32.xlu0 %v5086_v21, %s4335_s9 }
0x1a4d   :  { %2942 = vrot.lane.b32.xlu1 %v2939_v0, %s4335_s9 }
0x1a4f   :  { %2949 = vrot.lane.b32.xlu0 %v2925_v18, %s4324_s29 }
0x1a51   :  { %2955 = vrot.lane.b32.xlu1 %v2911_v55, %s4335_s9 }
0x1ab5   :  { %v3241_v27 = vpop.permute.xlu0 %3240 }
0x1ab6   :  { %3866 = vmatprep.mubr.msk.f32.mxu1 %vm225_vm4, %v3241_v27 }
0x1ab7   :  { %v3243_v33 = vpop.permute.xlu1 %3242 }
0x1ab8   :  { %3867 = vmatmul.mubr.msk.f32.vlgmr.msra.gmra.mrb[24].mxu1 %vm225_vm4, %v3243_v33 }
0x1ab9   :  { %v2928_v8 = vpop.permute.xlu0 %2927 }
0x1aba   :  { %2934 = vst.msk [vmem:[#allocation2 - $0x7] sm:$0x80] %vm2933_vm12, %v2928_v8 }
0x1abb   :  { %v2930_v52 = vpop.permute.xlu1 %2929 }
0x1abc   :  { %2936 = vst.msk [vmem:[#allocation2 + $0x1] sm:$0x1] %vm2935_vm13, %v2930_v52 }
0x1abd   :  { %v2941_v28 = vpop.permute.xlu0 %2940 }
0x1abe   :  { %2946 = vst.msk [vmem:[#allocation3 - $0x7] sm:$0x80] %vm2933_vm12, %v2941_v28 }
0x1abf   :  { %v2943_v1 = vpop.permute.xlu1 %2942 }
0x1ac0   :  { %2947 = vst.msk [vmem:[#allocation3 + $0x1] sm:$0x1] %vm2935_vm13, %v2943_v1 }
0x1ac1   :  { %v2950_v21 = vpop.permute.xlu0 %2949 }
0x1ac2   :  { %2953 = vst.msk [vmem:[#allocation2 + $0x2] sm:$0x3] %vm97_vm3, %v2950_v21 }
0x1ac3   :  { %v2956_v3 = vpop.permute.xlu1 %2955 }
0x1ac4   :  { %2958 = vst.msk [vmem:[#allocation3 + $0x2] sm:$0x3] %vm97_vm3, %v2956_v3 }
0x1b8b   :  { %v3868_v14 = vpop.f32.mrb[24].mxu1 }
0x1b8c   :  { %v3320_v32 = vadd.f32 %v3868_v14, %v3457_v9  ;;  %v3314_v31 = vpop.f32.mrb[25].mxu1 }
0x1b8d   :  { %v3315_v15 = vadd.f32 %v3457_v9, %v3314_v31 }
0x1b8e   :  { %3324 = vst.msk [vmem:[%s5178_s11 + $0x8] sm:$0xff] %vm126_vm2, %v3320_v32 }
0x1b8f   :  { %3323 = vst.msk [vmem:[%s5178_s11] sm:$0xff] %vm126_vm2, %v3315_v15 }
0x1b90   :  { %3329 = vsyncpa [#allocation5], 1 }
0x1b91   :  { %3330 = vsyncpa [#allocation7], 1 }
0x1b92   :  { %3331 = vsyncpa [#allocation10], 1 }

</bundles_post_ra>
